<compile_context>
chip_gen: v5e
topology: v5e:2x2
jax: 0.10.0
libtpu: 0.0.40
codegen_flags: <defaults>
</compile_context>

<pallas_src>
import functools

import jax
import jax.numpy as jnp
from jax.experimental import pallas as pl
from jax.experimental.pallas import tpu as pltpu


_GELU_C = 0.7978845608028654  # sqrt(2/pi)


def _gelu(x):
    # tanh-approximate GELU.
    # TODO(synk): PyTorch nn.GELU() default is the exact erf form; erf lowering
    # is not guaranteed on all TPU generations, tanh approx differs by <1e-3.
    return 0.5 * x * (1.0 + jnp.tanh(_GELU_C * (x + 0.044715 * x * x * x)))


def _vmem_budget():
    """Generation-aware VMEM budget (~75% of capacity, >= 32 MiB)."""
    try:
        cap = pltpu.get_tpu_info().vmem_capacity_bytes
    except Exception:
        cap = 64 << 20  # conservative (v7x per-core capacity)
    return max(int(cap * 0.75), 32 << 20)


def _pick_divisor(dim, candidates):
    for c in candidates:
        if dim >= c and dim % c == 0:
            return c
    return None


# ---------------------------------------------------------------------------
# Fused tiled matmul + bias (+ GELU) : y = act(x @ W + b)
# ---------------------------------------------------------------------------
def _linear_kernel_single(x_ref, w_ref, b_ref, o_ref, *, apply_gelu, compute_dtype):
    # gk == 1: no accumulator scratch, no epilogue copy.
    out = jnp.dot(x_ref[...].astype(compute_dtype),
                  w_ref[...].astype(compute_dtype),
                  preferred_element_type=jnp.float32)
    out = out + b_ref[...].astype(jnp.float32)
    if apply_gelu:
        out = _gelu(out)
    o_ref[...] = out.astype(o_ref.dtype)


def _linear_kernel_multi(x_ref, w_ref, b_ref, o_ref, acc_ref, *, n_k, apply_gelu,
                         compute_dtype):
    k = pl.program_id(2)

    @pl.when(k == 0)
    def _():
        acc_ref[...] = jnp.zeros_like(acc_ref)

    acc_ref[...] += jnp.dot(x_ref[...].astype(compute_dtype),
                            w_ref[...].astype(compute_dtype),
                            preferred_element_type=jnp.float32)

    @pl.when(k == n_k - 1)
    def _():
        out = acc_ref[...] + b_ref[...].astype(jnp.float32)
        if apply_gelu:
            out = _gelu(out)
        o_ref[...] = out.astype(o_ref.dtype)


def _linear_vmem_bytes(tm, tk, tn, gk, itemsize):
    return (2 * (tm * tk + tk * tn + tn) * itemsize          # double-buffered inputs
            + (tm * tn * 4 if gk > 1 else 0)                 # fp32 accumulator
            + 2 * tm * tn * itemsize)                        # double-buffered output


def linear_pallas(x2, w, b, *, apply_gelu=False, compute_dtype=jnp.bfloat16,
                  tk_max=1024, tn_max=512):
    """y = act(x2 @ w + b). x2: (rows, K), w: (K, N), b: (N,)."""
    rows, K = x2.shape
    Kw, N = w.shape
    assert K == Kw
    itemsize = x2.dtype.itemsize
    budget = _vmem_budget()

    # --- row tile: prefer a divisor of rows (no pad/slice HBM round trip) ---
    pad_rows = 0
    if rows <= 512:
        tm = rows                                    # full-extent block is always legal
    else:
        tm = _pick_divisor(rows, (512, 256, 128, 64, 32, 16, 8))
        if tm is None:
            # TODO(synk): masked partial-tile store instead of padding.
            tm = 256
            pad_rows = pl.cdiv(rows, tm) * tm - rows
            x2 = jnp.pad(x2, ((0, pad_rows), (0, 0)))
    rows_p = rows + pad_rows

    # --- K / N tiles (lane-aligned candidates, full extent fallback) ---
    tk = _pick_divisor(K, tuple(c for c in (1024, 512, 256, 128) if c <= tk_max)) or K
    tn = _pick_divisor(N, tuple(c for c in (512, 256, 128) if c <= tn_max)) or N

    # Shrink tk if the tile set does not fit the VMEM budget.
    while _linear_vmem_bytes(tm, tk, tn, K // tk, itemsize) > budget and tk > 128:
        nxt = tk // 2
        if K % nxt != 0:
            break
        tk = nxt

    gm, gn, gk = rows_p // tm, N // tn, K // tk
    b2 = b.reshape(1, N)

    need = _linear_vmem_bytes(tm, tk, tn, gk, itemsize)
    vmem_limit = min(budget, max(4 << 20, int(need * 1.5) + (1 << 20)))

    if gk == 1:
        kernel = functools.partial(_linear_kernel_single, apply_gelu=apply_gelu,
                                   compute_dtype=compute_dtype)
        grid = (gm, gn)
        in_specs = [
            pl.BlockSpec((tm, tk), lambda i, j: (i, 0)),
            pl.BlockSpec((tk, tn), lambda i, j: (0, j)),
            pl.BlockSpec((1, tn), lambda i, j: (0, j)),
        ]
        out_specs = pl.BlockSpec((tm, tn), lambda i, j: (i, j))
        scratch = []
        dims = ("parallel", "parallel")
    else:
        kernel = functools.partial(_linear_kernel_multi, n_k=gk, apply_gelu=apply_gelu,
                                   compute_dtype=compute_dtype)
        grid = (gm, gn, gk)
        in_specs = [
            pl.BlockSpec((tm, tk), lambda i, j, k: (i, k)),
            pl.BlockSpec((tk, tn), lambda i, j, k: (k, j)),
            pl.BlockSpec((1, tn), lambda i, j, k: (0, j)),
        ]
        out_specs = pl.BlockSpec((tm, tn), lambda i, j, k: (i, j))
        scratch = [pltpu.VMEM((tm, tn), jnp.float32)]
        dims = ("parallel", "parallel", "arbitrary")

    out = pl.pallas_call(
        kernel,
        out_shape=jax.ShapeDtypeStruct((rows_p, N), x2.dtype),
        grid_spec=pltpu.PrefetchScalarGridSpec(
            num_scalar_prefetch=0,
            grid=grid,
            in_specs=in_specs,
            out_specs=out_specs,
            scratch_shapes=scratch,
        ),
        compiler_params=pltpu.CompilerParams(
            dimension_semantics=dims,
            vmem_limit_bytes=vmem_limit,
        ),
    )(x2, w, b2)

    if pad_rows:
        out = out[:rows]
    return out


# ---------------------------------------------------------------------------
# Fused depthwise conv (kxk, pad (k-1)//2) + bias + GELU + residual add.
# Channels-last layout: (B, H, W, C); channels map to lanes, grid = (B, C//tc).
# ---------------------------------------------------------------------------
def _dwconv_kernel(x_ref, w_ref, b_ref, o_ref, pad_ref, *, H, W, ksize, sh, wl):
    p = (ksize - 1) // 2
    tc = o_ref.shape[-1]

    # Build the zero halo in VMEM (no wrapper-side jnp.pad / HBM round trip).
    # Interior store is sublane-aligned because wl is a multiple of 8.
    pad_ref[...] = jnp.zeros_like(pad_ref)
    pad_ref[p:p + H, wl:wl + W, :] = x_ref[0]

    w = w_ref[...].astype(jnp.float32)       # (k*k, tc)
    bias = b_ref[...].astype(jnp.float32)    # (1, tc)

    # Process output rows in strips so the f32 accumulator + current slab stay
    # small; only `ksize` column-shifted slabs materialize per strip (row
    # offsets are cheap outer-axis slices).
    for h0 in range(0, H, sh):
        rows = min(sh, H - h0)
        acc = jnp.zeros((rows, W, tc), jnp.float32)
        for dj in range(ksize):
            c0 = wl - p + dj
            slab = pad_ref[h0:h0 + rows + 2 * p, c0:c0 + W, :].astype(jnp.float32)
            for di in range(ksize):
                idx = di * ksize + dj
                acc = acc + slab[di:di + rows] * w[idx:idx + 1, :]
        y = _gelu(acc + bias)
        resid = x_ref[0, h0:h0 + rows].astype(jnp.float32)   # aligned residual read
        o_ref[0, h0:h0 + rows] = (resid + y).astype(o_ref.dtype)


def dwconv_gelu_residual_pallas(h4, wdw, bdw, *, ksize):
    """r = h4 + GELU(depthwise_conv(h4) + bdw). h4: (B, H, W, C)."""
    B, H, W, C = h4.shape
    p = (ksize - 1) // 2
    wl = ((p + 7) // 8) * 8 if p > 0 else 0   # sublane-aligned left halo
    itemsize = h4.dtype.itemsize
    budget = _vmem_budget()

    # Channel tile: depthwise conv is channel-independent, so tile C freely.
    tc = None
    for cand in (512, 256, 128):
        if C >= cand and C % cand == 0:
            need = (4 * H * W * cand + (H + 2 * p) * (wl + W + p) * cand) * itemsize
            if need <= budget // 2:
                tc = cand
                break
    if tc is None:
        tc = C  # full-extent block (always legal)
    gc = C // tc

    w2 = wdw.reshape(ksize * ksize, C)
    b2 = bdw.reshape(1, C)
    sh = min(8, H)

    blk_io = H * W * tc * itemsize
    blk_pad = (H + 2 * p) * (wl + W + p) * tc * itemsize
    need = 4 * blk_io + blk_pad + 2 * (ksize * ksize + 1) * tc * itemsize
    vmem_limit = min(budget, max(4 << 20, int(need * 1.5) + (1 << 20)))

    return pl.pallas_call(
        functools.partial(_dwconv_kernel, H=H, W=W, ksize=ksize, sh=sh, wl=wl),
        out_shape=jax.ShapeDtypeStruct((B, H, W, C), h4.dtype),
        grid_spec=pltpu.PrefetchScalarGridSpec(
            num_scalar_prefetch=0,
            grid=(B, gc),
            in_specs=[
                pl.BlockSpec((1, H, W, tc), lambda b, c: (b, 0, 0, c)),
                pl.BlockSpec((ksize * ksize, tc), lambda b, c: (0, c)),
                pl.BlockSpec((1, tc), lambda b, c: (0, c)),
            ],
            out_specs=pl.BlockSpec((1, H, W, tc), lambda b, c: (b, 0, 0, c)),
            scratch_shapes=[pltpu.VMEM((H + 2 * p, wl + W + p, tc), h4.dtype)],
        ),
        compiler_params=pltpu.CompilerParams(
            dimension_semantics=("parallel", "parallel"),
            vmem_limit_bytes=vmem_limit,
        ),
    )(h4, w2, b2)


# ---------------------------------------------------------------------------
# ConvFFN forward
# ---------------------------------------------------------------------------
def conv_ffn(x, x_size, w1, b1, wdw, bdw, w2, b2, *, ksize=5,
             compute_dtype=jnp.bfloat16):
    B, N, Din = x.shape
    H, W = x_size
    assert N == H * W
    hidden = w1.shape[1]

    # TODO(synk): longer term, fuse dwconv+residual into the fc2 pallas_call so
    # the hidden tensor r is never written to / re-read from HBM.
    h = linear_pallas(x.reshape(B * N, Din), w1, b1, apply_gelu=True,
                      compute_dtype=compute_dtype)                       # fc1 + GELU
    h4 = h.reshape(B, H, W, hidden)
    r = dwconv_gelu_residual_pallas(h4, wdw, bdw, ksize=ksize)           # x + GELU(dwconv(x))
    out = linear_pallas(r.reshape(B * N, hidden), w2, b2, apply_gelu=False,
                        compute_dtype=compute_dtype)                     # fc2
    return out.reshape(B, N, w2.shape[1])


if __name__ == "__main__":
    # Small shapes consistent with ConvFFN: tokens of an HxW feature map.
    # Channel dims are multiples of 128 so every output store is lane-dense.
    B, H, W = 2, 16, 16
    N = H * W
    Din, Dhid, Dout = 128, 128, 128
    ksize = 5

    key = jax.random.PRNGKey(0)
    kx, k1, k2, k3, k4, k5 = jax.random.split(key, 6)
    x = jax.random.normal(kx, (B, N, Din), jnp.float32)
    w1 = 0.05 * jax.random.normal(k1, (Din, Dhid), jnp.float32)
    b1 = jnp.full((Dhid,), 0.01, jnp.float32)
    wdw = 0.1 * jax.random.normal(k2, (ksize, ksize, Dhid), jnp.float32)
    bdw = jnp.full((Dhid,), 0.02, jnp.float32)
    w2 = 0.05 * jax.random.normal(k3, (Dhid, Dout), jnp.float32)
    b2 = jnp.full((Dout,), 0.03, jnp.float32)

    out = conv_ffn(x, (H, W), w1, b1, wdw, bdw, w2, b2, ksize=ksize)
    out = jax.block_until_ready(out)

    # ---------------- plain-JAX reference (same bf16-compute convention) -----
    def ref_linear(a, w, b):
        return jnp.dot(a.astype(jnp.bfloat16), w.astype(jnp.bfloat16),
                       preferred_element_type=jnp.float32) + b

    h_ref = _gelu(ref_linear(x.reshape(B * N, Din), w1, b1)).reshape(B, H, W, Dhid)
    conv_ref = jax.lax.conv_general_dilated(
        h_ref, wdw.reshape(ksize, ksize, 1, Dhid),
        window_strides=(1, 1), padding="SAME",
        dimension_numbers=("NHWC", "HWIO", "NHWC"),
        feature_group_count=Dhid)
    r_ref = h_ref + _gelu(conv_ref + bdw)
    out_ref = ref_linear(r_ref.reshape(B * N, Dhid), w2, b2).reshape(B, N, Dout)

    assert out.shape == (B, N, Dout)
    err = float(jnp.max(jnp.abs(out - out_ref)))
    assert jnp.allclose(out, out_ref, atol=3e-3, rtol=3e-3), err

    # ------- extra coverage: multi-K accumulator path (gk > 1) --------------
    xk = jax.random.normal(k4, (128, 256), jnp.float32)
    wk = 0.05 * jax.random.normal(k5, (256, 128), jnp.float32)
    bk = jnp.full((128,), 0.01, jnp.float32)
    yk = jax.block_until_ready(
        linear_pallas(xk, wk, bk, apply_gelu=True, tk_max=128))
    yk_ref = _gelu(ref_linear(xk, wk, bk))
    errk = float(jnp.max(jnp.abs(yk - yk_ref)))
    assert jnp.allclose(yk, yk_ref, atol=3e-3, rtol=3e-3), errk

    print("KERNEL_OK")
</pallas_src>

<mosaic_0001>
module attributes {stable_mosaic.version = 11 : i64} {
  func.func @_linear_kernel_single(%arg0: i32, %arg1: i32, %arg2: memref<512x128xf32, #tpu.memory_space<vmem>>, %arg3: memref<128x128xf32, #tpu.memory_space<vmem>>, %arg4: memref<1x128xf32, #tpu.memory_space<vmem>>, %arg5: memref<512x128xf32, #tpu.memory_space<vmem>>) attributes {dimension_semantics = [#tpu.dimension_semantics<parallel>, #tpu.dimension_semantics<parallel>], iteration_bounds = array<i64: 1, 1>, scalar_prefetch = 0 : i64, scratch_operands = 0 : i64, tpu.core_type = #tpu.core_type<tc>, window_params = [{transform_indices = @transform_0, window_bounds = array<i64: 512, 128>}, {transform_indices = @transform_1, window_bounds = array<i64: 128, 128>}, {transform_indices = @transform_2, window_bounds = array<i64: 1, 128>}, {transform_indices = @transform_3, window_bounds = array<i64: 512, 128>}]} {
    %c0 = arith.constant 0 : index
    %c0_0 = arith.constant 0 : index
    %0 = vector.load %arg2[%c0, %c0_0] : memref<512x128xf32, #tpu.memory_space<vmem>>, vector<512x128xf32>
    %1 = arith.truncf %0 : vector<512x128xf32> to vector<512x128xbf16>
    %c0_1 = arith.constant 0 : index
    %c0_2 = arith.constant 0 : index
    %2 = vector.load %arg3[%c0_1, %c0_2] : memref<128x128xf32, #tpu.memory_space<vmem>>, vector<128x128xf32>
    %3 = arith.truncf %2 : vector<128x128xf32> to vector<128x128xbf16>
    %cst = arith.constant dense<0.000000e+00> : vector<512x128xf32>
    %4 = tpu.matmul %1, %3, %cst {dimension_numbers = #tpu.dot_dimension_numbers<[1], [0], [0], [1], [0, 0, 1, 1], [], []>} : vector<512x128xbf16>, vector<128x128xbf16>, vector<512x128xf32> -> vector<512x128xf32>
    %c0_3 = arith.constant 0 : index
    %c0_4 = arith.constant 0 : index
    %5 = vector.load %arg4[%c0_3, %c0_4] : memref<1x128xf32, #tpu.memory_space<vmem>>, vector<1x128xf32>
    %6 = vector.broadcast %5 : vector<1x128xf32> to vector<512x128xf32>
    %7 = arith.addf %4, %6 : vector<512x128xf32>
    %cst_5 = arith.constant 5.000000e-01 : f32
    %8 = vector.broadcast %cst_5 : f32 to vector<512x128xf32>
    %9 = arith.mulf %8, %7 : vector<512x128xf32>
    %cst_6 = arith.constant 4.471500e-02 : f32
    %10 = vector.broadcast %cst_6 : f32 to vector<512x128xf32>
    %11 = arith.mulf %10, %7 : vector<512x128xf32>
    %12 = arith.mulf %11, %7 : vector<512x128xf32>
    %13 = arith.mulf %12, %7 : vector<512x128xf32>
    %14 = arith.addf %7, %13 : vector<512x128xf32>
    %cst_7 = arith.constant 0.797884583 : f32
    %15 = vector.broadcast %cst_7 : f32 to vector<512x128xf32>
    %16 = arith.mulf %15, %14 : vector<512x128xf32>
    %17 = math.tanh %16 : vector<512x128xf32>
    %cst_8 = arith.constant 1.000000e+00 : f32
    %18 = vector.broadcast %cst_8 : f32 to vector<512x128xf32>
    %19 = arith.addf %18, %17 : vector<512x128xf32>
    %20 = arith.mulf %9, %19 : vector<512x128xf32>
    %c0_9 = arith.constant 0 : index
    %c0_10 = arith.constant 0 : index
    %21 = vector.load %arg5[%c0_9, %c0_10] : memref<512x128xf32, #tpu.memory_space<vmem>>, vector<512x128xf32>
    tpu.vector_store %arg5[%c0_9, %c0_10], %20 {strides = array<i32>} : memref<512x128xf32, #tpu.memory_space<vmem>>, vector<512x128xf32>,
    return
  }
  func.func @transform_0(%arg0: i32, %arg1: i32) -> (i32, i32) {
    %c0_i32 = arith.constant 0 : i32
    %c0_i32_0 = arith.constant 0 : i32
    return %arg0, %c0_i32 : i32, i32
  }
  func.func @transform_1(%arg0: i32, %arg1: i32) -> (i32, i32) {
    %c0_i32 = arith.constant 0 : i32
    %c0_i32_0 = arith.constant 0 : i32
    return %c0_i32, %arg1 : i32, i32
  }
  func.func @transform_2(%arg0: i32, %arg1: i32) -> (i32, i32) {
    %c0_i32 = arith.constant 0 : i32
    %c0_i32_0 = arith.constant 0 : i32
    return %c0_i32, %arg1 : i32, i32
  }
  func.func @transform_3(%arg0: i32, %arg1: i32) -> (i32, i32) {
    %c0_i32 = arith.constant 0 : i32
    return %arg0, %arg1 : i32, i32
  }
}

</mosaic_0001>

<bundles_post_ra>
// kernel: tpu_custom_call.1
= control target key start
LH: loop header
LB: loop body
LE: loop exit
PB: predicated region body
PF: predicated region fallthrough
CT: control target
= control target key end

     0   :  { %8 = vsyncpa [#allocation3], 0  ;;  %s1767_s0 = inlined_call_operand.hbm [shape: f32[512,128], index: 0, kind: input, shape index: {}]   ;;  %s1768_s1 = inlined_call_operand.hbm [shape: f32[128,128], index: 1, kind: input, shape index: {}]   ;;  %s1769_s2 = inlined_call_operand.vmem [shape: f32[1,128], index: 2, kind: input, shape index: {}]   ;;  %s1770_s3 = inlined_call_operand.hbm [shape: f32[512,128], index: 3, kind: output, shape index: {}]  }
   0x1   :  { %9 = vsyncpa [#allocation6], 0 }
   0x2   :  { %10 = vsyncpa [#allocation4], 0  ;;  %s15_s14 = sshll.u32 %s1767_s0, 4  ;;  %s1237_s15 = smov [#allocation2]   ;;  %s16_s14 = int_to_ptr.hbm [resolvable:$true] %s15_s14 }
   0x3   :  { %s17_s16 = sshll.u32 %s1237_s15, 4  ;;  %s28_s19 = sshll.u32 %s1768_s1, 4  ;;  %s18_s16 = int_to_ptr.vmem [resolvable:$true] %s17_s16  ;;  %s29_s19 = int_to_ptr.hbm [resolvable:$true] %s28_s19 }
   0x4   :  { %s1238_s20 = smov 128   ;;  %s1239_s21 = smov 8  }
   0x5   :  { %23 = dma.hbm_to_vmem [thread:$0]  %s16_s14, 8192, %s18_s16, [#allocation3], %s1238_s20, %s1238_s20, %s1239_s21  }
   0x6   :  { %s1240_s22 = smov [#allocation5]  }
   0x7   :  { %s30_s23 = sshll.u32 %s1240_s22, 4  ;;  %s31_s23 = int_to_ptr.vmem [resolvable:$true] %s30_s23 }
   0x8   :  { %36 = dma.hbm_to_vmem [thread:$0]  %s29_s19, 2048, %s31_s23, [#allocation6], %s1238_s20, %s1238_s20, %s1239_s21  }
   0x9   :  { %1231 = dma.done.wait [#allocation3], 8192  }
   0xa   :  { %1232 = vsyncadd [#allocation3], 4294959104 }
   0xb   :  { %1233 = dma.done.wait [#allocation6], 2048  }
   0xc   :  { %1234 = vsyncadd [#allocation6], 4294965248  ;;  %v157_v0 = vld [vmem:[#allocation5 + $0x70] sm:$0xff]  ;;  %v158_v1 = vld [vmem:[#allocation5 + $0x78] sm:$0xff]  ;;  %s986_s29 = sshll.u32 %s1770_s3, 4  ;;  %s987_s29 = int_to_ptr.hbm [resolvable:$true] %s986_s29 }
   0xd   :  { %v155_v2 = vld [vmem:[#allocation5 + $0x60] sm:$0xff]  ;;  %v166_v3 = vpack.c.bf16 %v158_v1, %v157_v0  ;;  %v156_v4 = vld [vmem:[#allocation5 + $0x68] sm:$0xff]  ;;  %v153_v6 = vld [vmem:[#allocation5 + $0x50] sm:$0xff] }
   0xe   :  { %v165_v5 = vpack.c.bf16 %v156_v4, %v155_v2  ;;  %v154_v7 = vld [vmem:[#allocation5 + $0x58] sm:$0xff]  ;;  %v151_v9 = vld [vmem:[#allocation5 + $0x40] sm:$0xff]  ;;  %v152_v10 = vld [vmem:[#allocation5 + $0x48] sm:$0xff] }
   0xf   :  { %171 = vmatpush.bf16.msra.mxu0 %v166_v3  ;;  %1000 = vmatpush.bf16.msra.mxu1 %v166_v3  ;;  %v164_v8 = vpack.c.bf16 %v154_v7, %v153_v6  ;;  %v163_v11 = vpack.c.bf16 %v152_v10, %v151_v9  ;;  %v149_v12 = vld [vmem:[#allocation5 + $0x30] sm:$0xff]  ;;  %v150_v13 = vld [vmem:[#allocation5 + $0x38] sm:$0xff]  ;;  %v147_v15 = vld [vmem:[#allocation5 + $0x20] sm:$0xff] }
  0x10   :  { %1001 = vmatpush.bf16.msra.mxu2 %v166_v3  ;;  %1002 = vmatpush.bf16.msra.mxu3 %v166_v3  ;;  %v162_v14 = vpack.c.bf16 %v150_v13, %v149_v12  ;;  %v148_v16 = vld [vmem:[#allocation5 + $0x28] sm:$0xff]  ;;  %v145_v18 = vld [vmem:[#allocation5 + $0x10] sm:$0xff]  ;;  %v146_v19 = vld [vmem:[#allocation5 + $0x18] sm:$0xff] }
  0x11   :  { %v161_v17 = vpack.c.bf16 %v148_v16, %v147_v15  ;;  %v160_v20 = vpack.c.bf16 %v146_v19, %v145_v18  ;;  %v143_v21 = vld [vmem:[#allocation5] sm:$0xff]  ;;  %v144_v22 = vld [vmem:[#allocation5 + $0x8] sm:$0xff]  ;;  %v49_v36 = vld [vmem:[#allocation2 + $0x10] sm:$0xff] }
  0x12   :  { %v47_v23 = vld [vmem:[#allocation2] sm:$0xff]  ;;  %v48_v24 = vld [vmem:[#allocation2 + $0x8] sm:$0xff]  ;;  %v159_v25 = vpack.c.bf16 %v144_v22, %v143_v21  ;;  %v50_v37 = vld [vmem:[#allocation2 + $0x18] sm:$0xff] }
  0x13   :  { %172 = vmatpush.bf16.msra.mxu0 %v165_v5  ;;  %1003 = vmatpush.bf16.msra.mxu1 %v165_v5  ;;  %v63_v26 = vld [vmem:[#allocation2 + $0x80] sm:$0xff]  ;;  %v64_v27 = vld [vmem:[#allocation2 + $0x88] sm:$0xff]  ;;  %v111_v32 = vpack.c.bf16 %v48_v24, %v47_v23  ;;  %v65_v38 = vld [vmem:[#allocation2 + $0x90] sm:$0xff]  ;;  %v112_v44 = vpack.c.bf16 %v50_v37, %v49_v36 }
  0x14   :  { %1004 = vmatpush.bf16.msra.mxu2 %v165_v5  ;;  %1005 = vmatpush.bf16.msra.mxu3 %v165_v5  ;;  %v79_v28 = vld [vmem:[#allocation2 + $0x100] sm:$0xff]  ;;  %v80_v29 = vld [vmem:[#allocation2 + $0x108] sm:$0xff]  ;;  %v119_v33 = vpack.c.bf16 %v64_v27, %v63_v26  ;;  %v66_v39 = vld [vmem:[#allocation2 + $0x98] sm:$0xff] }
  0x15   :  { %v95_v30 = vld [vmem:[#allocation2 + $0x180] sm:$0xff]  ;;  %v96_v31 = vld [vmem:[#allocation2 + $0x188] sm:$0xff]  ;;  %v127_v34 = vpack.c.bf16 %v80_v29, %v79_v28  ;;  %v81_v40 = vld [vmem:[#allocation2 + $0x110] sm:$0xff]  ;;  %v120_v45 = vpack.c.bf16 %v66_v39, %v65_v38 }
  0x16   :  { %v135_v35 = vpack.c.bf16 %v96_v31, %v95_v30  ;;  %v82_v41 = vld [vmem:[#allocation2 + $0x118] sm:$0xff]  ;;  %v97_v42 = vld [vmem:[#allocation2 + $0x190] sm:$0xff]  ;;  %v51_v48 = vld [vmem:[#allocation2 + $0x20] sm:$0xff] }
  0x17   :  { %173 = vmatpush.bf16.msra.mxu0 %v164_v8  ;;  %1006 = vmatpush.bf16.msra.mxu1 %v164_v8  ;;  %v98_v43 = vld [vmem:[#allocation2 + $0x198] sm:$0xff]  ;;  %v128_v46 = vpack.c.bf16 %v82_v41, %v81_v40  ;;  %v52_v49 = vld [vmem:[#allocation2 + $0x28] sm:$0xff]  ;;  %v67_v50 = vld [vmem:[#allocation2 + $0xa0] sm:$0xff] }
  0x18   :  { %1007 = vmatpush.bf16.msra.mxu2 %v164_v8  ;;  %1008 = vmatpush.bf16.msra.mxu3 %v164_v8  ;;  %v136_v47 = vpack.c.bf16 %v98_v43, %v97_v42  ;;  %v68_v51 = vld [vmem:[#allocation2 + $0xa8] sm:$0xff]  ;;  %v83_v52 = vld [vmem:[#allocation2 + $0x120] sm:$0xff]  ;;  %v113_v56 = vpack.c.bf16 %v52_v49, %v51_v48  ;;  %v53_v60 = vld [vmem:[#allocation2 + $0x30] sm:$0xff] }
  0x19   :  { %v84_v53 = vld [vmem:[#allocation2 + $0x128] sm:$0xff]  ;;  %v99_v54 = vld [vmem:[#allocation2 + $0x1a0] sm:$0xff]  ;;  %v121_v57 = vpack.c.bf16 %v68_v51, %v67_v50  ;;  %v54_v61 = vld [vmem:[#allocation2 + $0x38] sm:$0xff] }
  0x1a   :  { %v100_v55 = vld [vmem:[#allocation2 + $0x1a8] sm:$0xff]  ;;  %v129_v58 = vpack.c.bf16 %v84_v53, %v83_v52  ;;  %v69_v62 = vld [vmem:[#allocation2 + $0xb0] sm:$0xff]  ;;  %v70_v63 = vld [vmem:[#allocation2 + $0xb8] sm:$0xff]  ;;  %v114_v4 = vpack.c.bf16 %v54_v61, %v53_v60 }
  0x1b   :  { %174 = vmatpush.bf16.msra.mxu0 %v163_v11  ;;  %1009 = vmatpush.bf16.msra.mxu1 %v163_v11  ;;  %v137_v59 = vpack.c.bf16 %v100_v55, %v99_v54  ;;  %v85_v0 = vld [vmem:[#allocation2 + $0x130] sm:$0xff]  ;;  %v86_v1 = vld [vmem:[#allocation2 + $0x138] sm:$0xff]  ;;  %v122_v5 = vpack.c.bf16 %v70_v63, %v69_v62  ;;  %v55_v8 = vld [vmem:[#allocation2 + $0x40] sm:$0xff] }
  0x1c   :  { %1010 = vmatpush.bf16.msra.mxu2 %v163_v11  ;;  %1011 = vmatpush.bf16.msra.mxu3 %v163_v11  ;;  %v101_v2 = vld [vmem:[#allocation2 + $0x1b0] sm:$0xff]  ;;  %v102_v3 = vld [vmem:[#allocation2 + $0x1b8] sm:$0xff]  ;;  %v130_v6 = vpack.c.bf16 %v86_v1, %v85_v0  ;;  %v56_v9 = vld [vmem:[#allocation2 + $0x48] sm:$0xff] }
  0x1d   :  { %v138_v7 = vpack.c.bf16 %v102_v3, %v101_v2  ;;  %v71_v10 = vld [vmem:[#allocation2 + $0xc0] sm:$0xff]  ;;  %v72_v11 = vld [vmem:[#allocation2 + $0xc8] sm:$0xff]  ;;  %v115_v16 = vpack.c.bf16 %v56_v9, %v55_v8  ;;  %v58_v21 = vld [vmem:[#allocation2 + $0x58] sm:$0xff] }
  0x1e   :  { %v87_v12 = vld [vmem:[#allocation2 + $0x140] sm:$0xff]  ;;  %v88_v13 = vld [vmem:[#allocation2 + $0x148] sm:$0xff]  ;;  %v73_v22 = vld [vmem:[#allocation2 + $0xd0] sm:$0xff] }
  0x1f   :  { %175 = vmatpush.bf16.msra.mxu0 %v162_v14  ;;  %1012 = vmatpush.bf16.msra.mxu1 %v162_v14  ;;  %v104_v15 = vld [vmem:[#allocation2 + $0x1c8] sm:$0xff]  ;;  %v131_v18 = vpack.c.bf16 %v88_v13, %v87_v12  ;;  %v74_v23 = vld [vmem:[#allocation2 + $0xd8] sm:$0xff]  ;;  %v89_v24 = vld [vmem:[#allocation2 + $0x150] sm:$0xff] }
  0x20   :  { %1013 = vmatpush.bf16.msra.mxu2 %v162_v14  ;;  %1014 = vmatpush.bf16.msra.mxu3 %v162_v14  ;;  %v103_v14 = vld [vmem:[#allocation2 + $0x1c0] sm:$0xff]  ;;  %v105_v26 = vld [vmem:[#allocation2 + $0x1d0] sm:$0xff]  ;;  %v106_v27 = vld [vmem:[#allocation2 + $0x1d8] sm:$0xff]  ;;  %v124_v29 = vpack.c.bf16 %v74_v23, %v73_v22 }
  0x21   :  { %v139_v19 = vpack.c.bf16 %v104_v15, %v103_v14  ;;  %v140_v31 = vpack.c.bf16 %v106_v27, %v105_v26  ;;  %v91_v36 = vld [vmem:[#allocation2 + $0x160] sm:$0xff]  ;;  %v92_v37 = vld [vmem:[#allocation2 + $0x168] sm:$0xff]  ;;  %v93_v48 = vld [vmem:[#allocation2 + $0x170] sm:$0xff] }
  0x22   :  { %v107_v38 = vld [vmem:[#allocation2 + $0x1e0] sm:$0xff]  ;;  %v108_v39 = vld [vmem:[#allocation2 + $0x1e8] sm:$0xff]  ;;  %v133_v42 = vpack.c.bf16 %v92_v37, %v91_v36  ;;  %v94_v49 = vld [vmem:[#allocation2 + $0x178] sm:$0xff] }
  0x23   :  { %176 = vmatpush.bf16.msra.mxu0 %v161_v17  ;;  %1015 = vmatpush.bf16.msra.mxu1 %v161_v17  ;;  %v141_v43 = vpack.c.bf16 %v108_v39, %v107_v38  ;;  %v109_v50 = vld [vmem:[#allocation2 + $0x1f0] sm:$0xff]  ;;  %v110_v51 = vld [vmem:[#allocation2 + $0x1f8] sm:$0xff]  ;;  %v134_v54 = vpack.c.bf16 %v94_v49, %v93_v48 }
  0x24   :  { %1016 = vmatpush.bf16.msra.mxu2 %v161_v17  ;;  %1017 = vmatpush.bf16.msra.mxu3 %v161_v17  ;;  %v123_v17 = vpack.c.bf16 %v72_v11, %v71_v10  ;;  %v142_v55 = vpack.c.bf16 %v110_v51, %v109_v50 }
  0x27   :  { %177 = vmatpush.bf16.msra.mxu0 %v160_v20  ;;  %1018 = vmatpush.bf16.msra.mxu1 %v160_v20 }
  0x28   :  { %1019 = vmatpush.bf16.msra.mxu2 %v160_v20  ;;  %1020 = vmatpush.bf16.msra.mxu3 %v160_v20  ;;  %v57_v20 = vld [vmem:[#allocation2 + $0x50] sm:$0xff] }
  0x29   :  { %v116_v28 = vpack.c.bf16 %v58_v21, %v57_v20 }
  0x2b   :  { %178 = vmatpush.bf16.msra.mxu0 %v159_v25  ;;  %1021 = vmatpush.bf16.msra.mxu1 %v159_v25 }
  0x2c   :  { %1022 = vmatpush.bf16.msra.mxu2 %v159_v25  ;;  %1023 = vmatpush.bf16.msra.mxu3 %v159_v25  ;;  %v90_v25 = vld [vmem:[#allocation2 + $0x158] sm:$0xff] }
  0x2d   :  { %v132_v30 = vpack.c.bf16 %v90_v25, %v89_v24 }
  0x2e   :  { %179 = vmatmul.bf16.vlgmr.msra.gmra.mxu0 %v111_v32  ;;  %219 = vmatmul.bf16.vlgmr.msra.gmra.mxu1 %v119_v33  ;;  %v59_v32 = vld [vmem:[#allocation2 + $0x60] sm:$0xff]  ;;  %v60_v33 = vld [vmem:[#allocation2 + $0x68] sm:$0xff] }
  0x2f   :  { %259 = vmatmul.bf16.vlgmr.msra.gmra.mxu2 %v127_v34  ;;  %299 = vmatmul.bf16.vlgmr.msra.gmra.mxu3 %v135_v35  ;;  %v75_v34 = vld [vmem:[#allocation2 + $0xe0] sm:$0xff]  ;;  %v76_v35 = vld [vmem:[#allocation2 + $0xe8] sm:$0xff]  ;;  %v117_v40 = vpack.c.bf16 %v60_v33, %v59_v32 }
  0x30   :  { %v125_v41 = vpack.c.bf16 %v76_v35, %v75_v34 }
  0x3e   :  { %184 = vmatmul.bf16.gmra.mxu0 %v112_v44  ;;  %224 = vmatmul.bf16.gmra.mxu1 %v120_v45  ;;  %v61_v44 = vld [vmem:[#allocation2 + $0x70] sm:$0xff]  ;;  %v62_v45 = vld [vmem:[#allocation2 + $0x78] sm:$0xff] }
  0x3f   :  { %264 = vmatmul.bf16.gmra.mxu2 %v128_v46  ;;  %304 = vmatmul.bf16.gmra.mxu3 %v136_v47  ;;  %v77_v46 = vld [vmem:[#allocation2 + $0xf0] sm:$0xff]  ;;  %v78_v47 = vld [vmem:[#allocation2 + $0xf8] sm:$0xff]  ;;  %v118_v52 = vpack.c.bf16 %v62_v45, %v61_v44 }
  0x40   :  { %v126_v53 = vpack.c.bf16 %v78_v47, %v77_v46 }
  0x4e   :  { %189 = vmatmul.bf16.gmra.mxu0 %v113_v56  ;;  %229 = vmatmul.bf16.gmra.mxu1 %v121_v57  ;;  %v1277_v56 = vld [vmem:[%s1769_s2] ss:$0 sm:$0xff] }
  0x4f   :  { %269 = vmatmul.bf16.gmra.mxu2 %v129_v58  ;;  %309 = vmatmul.bf16.gmra.mxu3 %v137_v59 }
  0x5e   :  { %194 = vmatmul.bf16.gmra.mxu0 %v114_v4  ;;  %234 = vmatmul.bf16.gmra.mxu1 %v122_v5 }
  0x5f   :  { %274 = vmatmul.bf16.gmra.mxu2 %v130_v6  ;;  %314 = vmatmul.bf16.gmra.mxu3 %v138_v7 }
  0x6e   :  { %199 = vmatmul.bf16.gmra.mxu0 %v115_v16  ;;  %239 = vmatmul.bf16.gmra.mxu1 %v123_v17 }
  0x6f   :  { %279 = vmatmul.bf16.gmra.mxu2 %v131_v18  ;;  %319 = vmatmul.bf16.gmra.mxu3 %v139_v19 }
  0x7e   :  { %204 = vmatmul.bf16.gmra.mxu0 %v116_v28  ;;  %244 = vmatmul.bf16.gmra.mxu1 %v124_v29 }
  0x7f   :  { %284 = vmatmul.bf16.gmra.mxu2 %v132_v30  ;;  %324 = vmatmul.bf16.gmra.mxu3 %v140_v31 }
  0x8e   :  { %209 = vmatmul.bf16.gmra.mxu0 %v117_v40  ;;  %249 = vmatmul.bf16.gmra.mxu1 %v125_v41 }
  0x8f   :  { %289 = vmatmul.bf16.gmra.mxu2 %v133_v42  ;;  %329 = vmatmul.bf16.gmra.mxu3 %v141_v43 }
  0x9e   :  { %214 = vmatmul.bf16.gmra.mxu0 %v118_v52  ;;  %254 = vmatmul.bf16.gmra.mxu1 %v126_v53 }
  0x9f   :  { %294 = vmatmul.bf16.gmra.mxu2 %v134_v54  ;;  %334 = vmatmul.bf16.gmra.mxu3 %v142_v55 }
  0xab   :  { %v180_v57 = vpop.f32.mrf.mxu0  ;;  %v220_v58 = vpop.f32.mrf.mxu1 }
  0xac   :  { %v181_v59 = vadd.f32 %v1277_v56, %v180_v57  ;;  %v221_v60 = vadd.f32 %v1277_v56, %v220_v58 }
  0xae   :  { %v404_v61 = vmul.f32 0.044715, %v181_v59  ;;  %v420_v62 = vmul.f32 0.044715, %v221_v60  ;;  %v340_v33 = vmul.f32 0.5, %v181_v59  ;;  %v356_v34 = vmul.f32 0.5, %v221_v60 }
  0xb0   :  { %v468_v63 = vmul.f32 %v404_v61, %v181_v59  ;;  %v484_v0 = vmul.f32 %v420_v62, %v221_v60 }
  0xb2   :  { %v532_v1 = vmul.f32 %v468_v63, %v181_v59  ;;  %v548_v2 = vmul.f32 %v484_v0, %v221_v60  ;;  %v260_v3 = vpop.f32.mrf.mxu2  ;;  %v300_v4 = vpop.f32.mrf.mxu3 }
  0xb3   :  { %v261_v5 = vadd.f32 %v1277_v56, %v260_v3  ;;  %v301_v6 = vadd.f32 %v1277_v56, %v300_v4  ;;  %v182_v7 = vpop.f32.mrf.mxu0  ;;  %v222_v8 = vpop.f32.mrf.mxu1 }
  0xb4   :  { %v596_v9 = vadd.f32 %v532_v1, %v181_v59  ;;  %v612_v10 = vadd.f32 %v548_v2, %v221_v60  ;;  %v1284_v11 = vadd.f32 %v1277_v56, %v182_v7  ;;  %v1287_v12 = vadd.f32 %v1277_v56, %v222_v8 }
  0xb5   :  { %v436_v13 = vmul.f32 0.044715, %v261_v5  ;;  %v452_v14 = vmul.f32 0.044715, %v301_v6  ;;  %v372_v42 = vmul.f32 0.5, %v261_v5  ;;  %v388_v58 = vmul.f32 0.5, %v301_v6 }
  0xb6   :  { %v660_v15 = vmul.f32 0.7978846, %v596_v9  ;;  %v676_v16 = vmul.f32 0.7978846, %v612_v10  ;;  %v405_v19 = vmul.f32 0.044715, %v1284_v11 }
  0xb7   :  { %v500_v17 = vmul.f32 %v436_v13, %v261_v5  ;;  %v516_v18 = vmul.f32 %v452_v14, %v301_v6  ;;  %v421_v20 = vmul.f32 0.044715, %v1287_v12  ;;  %v341_v4 = vmul.f32 0.5, %v1284_v11 }
  0xb8   :  { %1030 = vtanh.f32 %v660_v15  ;;  %v469_v23 = vmul.f32 %v405_v19, %v1284_v11 }
  0xb9   :  { %1032 = vtanh.f32 %v676_v16  ;;  %v564_v21 = vmul.f32 %v500_v17, %v261_v5  ;;  %v580_v22 = vmul.f32 %v516_v18, %v301_v6  ;;  %v485_v24 = vmul.f32 %v421_v20, %v1287_v12 }
  0xba   :  { %v262_v25 = vpop.f32.mrf.mxu2  ;;  %v302_v26 = vpop.f32.mrf.mxu3  ;;  %v533_v29 = vmul.f32 %v469_v23, %v1284_v11 }
  0xbb   :  { %v628_v27 = vadd.f32 %v564_v21, %v261_v5  ;;  %v644_v28 = vadd.f32 %v580_v22, %v301_v6  ;;  %v1295_v30 = vadd.f32 %v1277_v56, %v262_v25  ;;  %v185_v31 = vpop.f32.mrf.mxu0  ;;  %v225_v32 = vpop.f32.mrf.mxu1  ;;  %v549_v35 = vmul.f32 %v485_v24, %v1287_v12 }
  0xbc   :  { %v1299_v36 = vadd.f32 %v1277_v56, %v302_v26  ;;  %v597_v39 = vadd.f32 %v533_v29, %v1284_v11  ;;  %v1303_v40 = vadd.f32 %v1277_v56, %v185_v31  ;;  %v1309_v49 = vadd.f32 %v1277_v56, %v225_v32 }
  0xbd   :  { %v692_v37 = vmul.f32 0.7978846, %v628_v27  ;;  %v708_v38 = vmul.f32 0.7978846, %v644_v28  ;;  %v613_v43 = vadd.f32 %v549_v35, %v1287_v12  ;;  %v437_v44 = vmul.f32 0.044715, %v1295_v30 }
  0xbe   :  { %v1031_v41 = vpop.eup %1030  ;;  %v453_v45 = vmul.f32 0.044715, %v1299_v36  ;;  %v661_v48 = vmul.f32 0.7978846, %v597_v39  ;;  %v406_v55 = vmul.f32 0.044715, %v1303_v40 }
  0xbf   :  { %v1033_v46 = vpop.eup %1032  ;;  %v788_v47 = vadd.f32 1.0, %v1031_v41  ;;  %1034 = vtanh.f32 %v692_v37  ;;  %v677_v51 = vmul.f32 0.7978846, %v613_v43  ;;  %v501_v52 = vmul.f32 %v437_v44, %v1295_v30 }
  0xc0   :  { %v804_v50 = vadd.f32 1.0, %v1033_v46  ;;  %1036 = vtanh.f32 %v708_v38  ;;  %v517_v54 = vmul.f32 %v453_v45, %v1299_v36  ;;  %v470_v63 = vmul.f32 %v406_v55, %v1303_v40 }
  0xc1   :  { %v852_v53 = vmul.f32 %v788_v47, %v340_v33  ;;  %1038 = vtanh.f32 %v661_v48  ;;  %v565_v59 = vmul.f32 %v501_v52, %v1295_v30  ;;  %v422_v0 = vmul.f32 0.044715, %v1309_v49 }
  0xc2   :  { %v868_v57 = vmul.f32 %v804_v50, %v356_v34  ;;  %1040 = vtanh.f32 %v677_v51  ;;  %v265_v60 = vpop.f32.mrf.mxu2  ;;  %v305_v61 = vpop.f32.mrf.mxu3  ;;  %v581_v62 = vmul.f32 %v517_v54, %v1299_v36  ;;  %v357_v5 = vmul.f32 0.5, %v1287_v12 }
  0xc3   :  { %916 = vst [vmem:[#allocation7] sm:$0xff] %v852_v53  ;;  %v1319_v1 = vadd.f32 %v1277_v56, %v265_v60  ;;  %v187_v2 = vpop.f32.mrf.mxu0  ;;  %v227_v3 = vpop.f32.mrf.mxu1  ;;  %v629_v6 = vadd.f32 %v565_v59, %v1295_v30  ;;  %v1325_v7 = vadd.f32 %v1277_v56, %v305_v61  ;;  %v534_v10 = vmul.f32 %v470_v63, %v1303_v40 }
  0xc4   :  { %932 = vst [vmem:[#allocation7 + $0x80] sm:$0xff] %v868_v57  ;;  %v645_v9 = vadd.f32 %v581_v62, %v1299_v36  ;;  %v486_v13 = vmul.f32 %v422_v0, %v1309_v49  ;;  %v1331_v14 = vadd.f32 %v1277_v56, %v187_v2  ;;  %v1335_v17 = vadd.f32 %v1277_v56, %v227_v3 }
  0xc5   :  { %v1035_v8 = vpop.eup %1034  ;;  %v693_v11 = vmul.f32 0.7978846, %v629_v6  ;;  %v438_v12 = vmul.f32 0.044715, %v1319_v1  ;;  %v598_v21 = vadd.f32 %v534_v10, %v1303_v40  ;;  %v454_v34 = vmul.f32 0.044715, %v1325_v7 }
  0xc6   :  { %v1037_v15 = vpop.eup %1036  ;;  %v820_v16 = vadd.f32 1.0, %v1035_v8  ;;  %v709_v20 = vmul.f32 0.7978846, %v645_v9  ;;  %v550_v22 = vmul.f32 %v486_v13, %v1309_v49  ;;  %v373_v38 = vmul.f32 0.5, %v1295_v30 }
  0xc7   :  { %v1039_v18 = vpop.eup %1038  ;;  %v836_v19 = vadd.f32 1.0, %v1037_v15  ;;  %1042 = vtanh.f32 %v693_v11  ;;  %v502_v26 = vmul.f32 %v438_v12, %v1319_v1  ;;  %v662_v29 = vmul.f32 0.7978846, %v598_v21 }
  0xc8   :  { %v1041_v23 = vpop.eup %1040  ;;  %v884_v24 = vmul.f32 %v820_v16, %v372_v42  ;;  %v789_v25 = vadd.f32 1.0, %v1039_v18  ;;  %1044 = vtanh.f32 %v709_v20  ;;  %v614_v32 = vadd.f32 %v550_v22, %v1309_v49 }
  0xc9   :  { %v900_v27 = vmul.f32 %v836_v19, %v388_v58  ;;  %v805_v28 = vadd.f32 1.0, %v1041_v23  ;;  %v566_v33 = vmul.f32 %v502_v26, %v1319_v1  ;;  %1046 = vtanh.f32 %v662_v29 }
  0xca   :  { %948 = vst [vmem:[#allocation7 + $0x100] sm:$0xff] %v884_v24  ;;  %v853_v31 = vmul.f32 %v789_v25, %v341_v4  ;;  %v267_v35 = vpop.f32.mrf.mxu2  ;;  %v407_v39 = vmul.f32 0.044715, %v1331_v14  ;;  %v307_v41 = vpop.f32.mrf.mxu3  ;;  %v389_v42 = vmul.f32 0.5, %v1299_v36  ;;  %v678_v43 = vmul.f32 0.7978846, %v614_v32 }
  0xcb   :  { %964 = vst [vmem:[#allocation7 + $0x180] sm:$0xff] %v900_v27  ;;  %v869_v37 = vmul.f32 %v805_v28, %v357_v5  ;;  %v630_v44 = vadd.f32 %v566_v33, %v1319_v1  ;;  %v518_v45 = vmul.f32 %v454_v34, %v1325_v7  ;;  %v190_v46 = vpop.f32.mrf.mxu0  ;;  %v342_v47 = vmul.f32 0.5, %v1303_v40  ;;  %v230_v4 = vpop.f32.mrf.mxu1 }
  0xcc   :  { %917 = vst [vmem:[#allocation7 + $0x8] sm:$0xff] %v853_v31  ;;  %v471_v48 = vmul.f32 %v407_v39, %v1331_v14  ;;  %v423_v30 = vmul.f32 0.044715, %v1335_v17  ;;  %v1352_v50 = vadd.f32 %v1277_v56, %v267_v35  ;;  %1048 = vtanh.f32 %v678_v43 }
  0xcd   :  { %933 = vst [vmem:[#allocation7 + $0x88] sm:$0xff] %v869_v37  ;;  %v1043_v51 = vpop.eup %1042  ;;  %v694_v52 = vmul.f32 0.7978846, %v630_v44  ;;  %v582_v36 = vmul.f32 %v518_v45, %v1325_v7  ;;  %v1356_v53 = vadd.f32 %v1277_v56, %v307_v41  ;;  %v1361_v58 = vadd.f32 %v1277_v56, %v190_v46 }
  0xce   :  { %v1045_v54 = vpop.eup %1044  ;;  %v821_v55 = vadd.f32 1.0, %v1043_v51  ;;  %v535_v57 = vmul.f32 %v471_v48, %v1331_v14  ;;  %v487_v40 = vmul.f32 %v423_v30, %v1335_v17  ;;  %v439_v61 = vmul.f32 0.044715, %v1352_v50 }
  0xcf   :  { %v837_v59 = vadd.f32 1.0, %v1045_v54  ;;  %1050 = vtanh.f32 %v694_v52  ;;  %v646_v60 = vadd.f32 %v582_v36, %v1325_v7  ;;  %v1047_v62 = vpop.eup %1046  ;;  %v358_v0 = vmul.f32 0.5, %v1309_v49 }
  0xd0   :  { %v885_v63 = vmul.f32 %v821_v55, %v373_v38  ;;  %v599_v2 = vadd.f32 %v535_v57, %v1331_v14  ;;  %v551_v3 = vmul.f32 %v487_v40, %v1335_v17  ;;  %v790_v6 = vadd.f32 1.0, %v1047_v62 }
  0xd1   :  { %v901_v5 = vmul.f32 %v837_v59, %v389_v42  ;;  %v710_v8 = vmul.f32 0.7978846, %v646_v60  ;;  %v503_v9 = vmul.f32 %v439_v61, %v1352_v50  ;;  %v374_v13 = vmul.f32 0.5, %v1319_v1 }
  0xd2   :  { %v270_v10 = vpop.f32.mrf.mxu2  ;;  %949 = vst [vmem:[#allocation7 + $0x108] sm:$0xff] %v885_v63  ;;  %v663_v15 = vmul.f32 0.7978846, %v599_v2  ;;  %v615_v16 = vadd.f32 %v551_v3, %v1335_v17  ;;  %v455_v11 = vmul.f32 0.044715, %v1356_v53  ;;  %v1049_v49 = vpop.eup %1048  ;;  %v854_v12 = vmul.f32 %v790_v6, %v342_v47 }
  0xd3   :  { %965 = vst [vmem:[#allocation7 + $0x188] sm:$0xff] %v901_v5  ;;  %1052 = vtanh.f32 %v710_v8  ;;  %v567_v18 = vmul.f32 %v503_v9, %v1352_v50  ;;  %v408_v19 = vmul.f32 0.044715, %v1361_v58  ;;  %v806_v20 = vadd.f32 1.0, %v1049_v49  ;;  %v310_v23 = vpop.f32.mrf.mxu3  ;;  %v192_v32 = vpop.f32.mrf.mxu0 }
  0xd4   :  { %1054 = vtanh.f32 %v663_v15  ;;  %v679_v21 = vmul.f32 0.7978846, %v615_v16  ;;  %v519_v22 = vmul.f32 %v455_v11, %v1356_v53  ;;  %918 = vst [vmem:[#allocation7 + $0x10] sm:$0xff] %v854_v12  ;;  %v1378_v26 = vadd.f32 %v1277_v56, %v230_v4  ;;  %v232_v51 = vpop.f32.mrf.mxu1 }
  0xd5   :  { %v1051_v1 = vpop.eup %1050  ;;  %v631_v24 = vadd.f32 %v567_v18, %v1352_v50  ;;  %v472_v25 = vmul.f32 %v408_v19, %v1361_v58  ;;  %v1381_v27 = vadd.f32 %v1277_v56, %v270_v10  ;;  %v870_v28 = vmul.f32 %v806_v20, %v358_v0 }
  0xd6   :  { %v822_v29 = vadd.f32 1.0, %v1051_v1  ;;  %1056 = vtanh.f32 %v679_v21  ;;  %v583_v31 = vmul.f32 %v519_v22, %v1356_v53  ;;  %v390_v33 = vmul.f32 0.5, %v1325_v7 }
  0xd7   :  { %v695_v34 = vmul.f32 0.7978846, %v631_v24  ;;  %v536_v35 = vmul.f32 %v472_v25, %v1361_v58  ;;  %v424_v37 = vmul.f32 0.044715, %v1378_v26  ;;  %934 = vst [vmem:[#allocation7 + $0x90] sm:$0xff] %v870_v28  ;;  %v343_v39 = vmul.f32 0.5, %v1331_v14 }
  0xd8   :  { %v886_v38 = vmul.f32 %v822_v29, %v374_v13  ;;  %v647_v41 = vadd.f32 %v583_v31, %v1356_v53  ;;  %v440_v42 = vmul.f32 0.044715, %v1381_v27  ;;  %v1393_v7 = vadd.f32 %v1277_v56, %v310_v23 }
  0xd9   :  { %v1053_v43 = vpop.eup %1052  ;;  %1058 = vtanh.f32 %v695_v34  ;;  %v600_v44 = vadd.f32 %v536_v35, %v1361_v58  ;;  %v488_v45 = vmul.f32 %v424_v37, %v1378_v26  ;;  %v1397_v14 = vadd.f32 %v1277_v56, %v192_v32 }
  0xda   :  { %v1055_v46 = vpop.eup %1054  ;;  %950 = vst [vmem:[#allocation7 + $0x110] sm:$0xff] %v886_v38  ;;  %v838_v47 = vadd.f32 1.0, %v1053_v43  ;;  %v711_v48 = vmul.f32 0.7978846, %v647_v41  ;;  %v504_v30 = vmul.f32 %v440_v42, %v1381_v27  ;;  %v272_v52 = vpop.f32.mrf.mxu2  ;;  %v359_v54 = vmul.f32 0.5, %v1335_v17 }
  0xdb   :  { %v791_v36 = vadd.f32 1.0, %v1055_v46  ;;  %v664_v55 = vmul.f32 0.7978846, %v600_v44  ;;  %v552_v57 = vmul.f32 %v488_v45, %v1378_v26  ;;  %v456_v61 = vmul.f32 0.044715, %v1393_v7  ;;  %v312_v5 = vpop.f32.mrf.mxu3  ;;  %v195_v49 = vpop.f32.mrf.mxu0 }
  0xdc   :  { %v1057_v40 = vpop.eup %1056  ;;  %v902_v59 = vmul.f32 %v838_v47, %v390_v33  ;;  %1060 = vtanh.f32 %v711_v48  ;;  %v568_v60 = vmul.f32 %v504_v30, %v1381_v27  ;;  %v375_v2 = vmul.f32 0.5, %v1352_v50  ;;  %v235_v33 = vpop.f32.mrf.mxu1 }
  0xdd   :  { %v855_v62 = vmul.f32 %v791_v36, %v343_v39  ;;  %v807_v63 = vadd.f32 1.0, %v1057_v40  ;;  %1062 = vtanh.f32 %v664_v55  ;;  %v616_v0 = vadd.f32 %v552_v57, %v1378_v26 }
  0xde   :  { %966 = vst [vmem:[#allocation7 + $0x190] sm:$0xff] %v902_v59  ;;  %v632_v17 = vadd.f32 %v568_v60, %v1381_v27  ;;  %v520_v3 = vmul.f32 %v456_v61, %v1393_v7  ;;  %v409_v4 = vmul.f32 0.044715, %v1397_v14  ;;  %v1409_v10 = vadd.f32 %v1277_v56, %v232_v51 }
  0xdf   :  { %v1059_v6 = vpop.eup %1058  ;;  %919 = vst [vmem:[#allocation7 + $0x18] sm:$0xff] %v855_v62  ;;  %v871_v8 = vmul.f32 %v807_v63, %v359_v54  ;;  %v680_v9 = vmul.f32 0.7978846, %v616_v0  ;;  %v1412_v13 = vadd.f32 %v1277_v56, %v272_v52  ;;  %v391_v12 = vmul.f32 0.5, %v1356_v53 }
  0xe0   :  { %v823_v15 = vadd.f32 1.0, %v1059_v6  ;;  %v696_v16 = vmul.f32 0.7978846, %v632_v17  ;;  %v584_v50 = vmul.f32 %v520_v3, %v1393_v7  ;;  %v473_v11 = vmul.f32 %v409_v4, %v1397_v14 }
  0xe1   :  { %935 = vst [vmem:[#allocation7 + $0x98] sm:$0xff] %v871_v8  ;;  %v344_v18 = vmul.f32 0.5, %v1361_v58  ;;  %1064 = vtanh.f32 %v680_v9  ;;  %v425_v19 = vmul.f32 0.044715, %v1409_v10  ;;  %v441_v28 = vmul.f32 0.044715, %v1412_v13 }
  0xe2   :  { %v1061_v20 = vpop.eup %1060  ;;  %v887_v21 = vmul.f32 %v823_v15, %v375_v2  ;;  %1066 = vtanh.f32 %v696_v16  ;;  %v648_v22 = vadd.f32 %v584_v50, %v1393_v7  ;;  %v537_v23 = vmul.f32 %v473_v11, %v1397_v14  ;;  %v275_v34 = vpop.f32.mrf.mxu2 }
  0xe3   :  { %v1063_v1 = vpop.eup %1062  ;;  %v839_v24 = vadd.f32 1.0, %v1061_v20  ;;  %v489_v25 = vmul.f32 %v425_v19, %v1409_v10  ;;  %v1424_v53 = vadd.f32 %v1277_v56, %v312_v5  ;;  %v1428_v32 = vadd.f32 %v1277_v56, %v195_v49  ;;  %v315_v36 = vpop.f32.mrf.mxu3 }
  0xe4   :  { %951 = vst [vmem:[#allocation7 + $0x118] sm:$0xff] %v887_v21  ;;  %v792_v58 = vadd.f32 1.0, %v1063_v1  ;;  %v712_v29 = vmul.f32 0.7978846, %v648_v22  ;;  %v601_v31 = vadd.f32 %v537_v23, %v1397_v14  ;;  %v360_v37 = vmul.f32 0.5, %v1378_v26  ;;  %v197_v62 = vpop.f32.mrf.mxu0 }
  0xe5   :  { %v903_v35 = vmul.f32 %v839_v24, %v391_v12  ;;  %v553_v38 = vmul.f32 %v489_v25, %v1409_v10  ;;  %v505_v39 = vmul.f32 %v441_v28, %v1412_v13  ;;  %v457_v43 = vmul.f32 0.044715, %v1424_v53  ;;  %v237_v12 = vpop.f32.mrf.mxu1 }
  0xe6   :  { %v856_v41 = vmul.f32 %v792_v58, %v344_v18  ;;  %1068 = vtanh.f32 %v712_v29  ;;  %v665_v42 = vmul.f32 0.7978846, %v601_v31  ;;  %v376_v45 = vmul.f32 0.5, %v1381_v27 }
  0xe7   :  { %v1065_v44 = vpop.eup %1064  ;;  %967 = vst [vmem:[#allocation7 + $0x198] sm:$0xff] %v903_v35  ;;  %v617_v46 = vadd.f32 %v553_v38, %v1409_v10  ;;  %v569_v47 = vmul.f32 %v505_v39, %v1412_v13  ;;  %v410_v48 = vmul.f32 0.044715, %v1428_v32  ;;  %v521_v51 = vmul.f32 %v457_v43, %v1424_v53 }
  0xe8   :  { %v1067_v26 = vpop.eup %1066  ;;  %920 = vst [vmem:[#allocation7 + $0x20] sm:$0xff] %v856_v41  ;;  %v808_v30 = vadd.f32 1.0, %v1065_v44  ;;  %1070 = vtanh.f32 %v665_v42  ;;  %v1440_v52 = vadd.f32 %v1277_v56, %v235_v33  ;;  %v392_v59 = vmul.f32 0.5, %v1393_v7 }
  0xe9   :  { %v824_v54 = vadd.f32 1.0, %v1067_v26  ;;  %v681_v55 = vmul.f32 0.7978846, %v617_v46  ;;  %v633_v27 = vadd.f32 %v569_v47, %v1412_v13  ;;  %v474_v57 = vmul.f32 %v410_v48, %v1428_v32 }
  0xea   :  { %v872_v40 = vmul.f32 %v808_v30, %v360_v37  ;;  %v585_v60 = vmul.f32 %v521_v51, %v1424_v53  ;;  %v426_v61 = vmul.f32 0.044715, %v1440_v52  ;;  %v1451_v5 = vadd.f32 %v1277_v56, %v275_v34  ;;  %v277_v18 = vpop.f32.mrf.mxu2 }
  0xeb   :  { %v888_v63 = vmul.f32 %v824_v54, %v376_v45  ;;  %1072 = vtanh.f32 %v681_v55  ;;  %v697_v0 = vmul.f32 0.7978846, %v633_v27  ;;  %v538_v2 = vmul.f32 %v474_v57, %v1428_v32  ;;  %v317_v34 = vpop.f32.mrf.mxu3 }
  0xec   :  { %v1069_v17 = vpop.eup %1068  ;;  %936 = vst [vmem:[#allocation7 + $0xa0] sm:$0xff] %v872_v40  ;;  %v649_v3 = vadd.f32 %v585_v60, %v1424_v53  ;;  %v490_v4 = vmul.f32 %v426_v61, %v1440_v52  ;;  %v1454_v7 = vadd.f32 %v1277_v56, %v315_v36  ;;  %v1458_v9 = vadd.f32 %v1277_v56, %v197_v62  ;;  %v200_v44 = vpop.f32.mrf.mxu0 }
  0xed   :  { %952 = vst [vmem:[#allocation7 + $0x120] sm:$0xff] %v888_v63  ;;  %v840_v6 = vadd.f32 1.0, %v1069_v17  ;;  %1074 = vtanh.f32 %v697_v0  ;;  %v602_v8 = vadd.f32 %v538_v2, %v1428_v32  ;;  %v345_v16 = vmul.f32 0.5, %v1397_v14  ;;  %v240_v61 = vpop.f32.mrf.mxu1 }
  0xee   :  { %v1071_v15 = vpop.eup %1070  ;;  %v713_v50 = vmul.f32 0.7978846, %v649_v3  ;;  %v554_v11 = vmul.f32 %v490_v4, %v1440_v52  ;;  %v442_v49 = vmul.f32 0.044715, %v1451_v5  ;;  %v361_v21 = vmul.f32 0.5, %v1409_v10 }
  0xef   :  { %v904_v19 = vmul.f32 %v840_v6, %v392_v59  ;;  %v793_v20 = vadd.f32 1.0, %v1071_v15  ;;  %v666_v22 = vmul.f32 0.7978846, %v602_v8  ;;  %v458_v24 = vmul.f32 0.044715, %v1454_v7 }
  0xf0   :  { %1076 = vtanh.f32 %v713_v50  ;;  %v618_v23 = vadd.f32 %v554_v11, %v1440_v52  ;;  %v506_v1 = vmul.f32 %v442_v49, %v1451_v5  ;;  %v377_v28 = vmul.f32 0.5, %v1412_v13 }
  0xf1   :  { %v1073_v14 = vpop.eup %1072  ;;  %968 = vst [vmem:[#allocation7 + $0x1a0] sm:$0xff] %v904_v19  ;;  %v857_v25 = vmul.f32 %v793_v20, %v345_v16  ;;  %1078 = vtanh.f32 %v666_v22  ;;  %v411_v58 = vmul.f32 0.044715, %v1458_v9  ;;  %v522_v33 = vmul.f32 %v458_v24, %v1454_v7 }
  0xf2   :  { %v809_v29 = vadd.f32 1.0, %v1073_v14  ;;  %v682_v31 = vmul.f32 0.7978846, %v618_v23  ;;  %v570_v10 = vmul.f32 %v506_v1, %v1451_v5  ;;  %v393_v37 = vmul.f32 0.5, %v1424_v53  ;;  %v280_v62 = vpop.f32.mrf.mxu2 }
  0xf3   :  { %v1075_v35 = vpop.eup %1074  ;;  %921 = vst [vmem:[#allocation7 + $0x28] sm:$0xff] %v857_v25  ;;  %v475_v38 = vmul.f32 %v411_v58, %v1458_v9  ;;  %v1474_v39 = vadd.f32 %v1277_v56, %v237_v12  ;;  %v1477_v13 = vadd.f32 %v1277_v56, %v277_v18  ;;  %v346_v45 = vmul.f32 0.5, %v1428_v32  ;;  %v320_v18 = vpop.f32.mrf.mxu3 }
  0xf4   :  { %v873_v41 = vmul.f32 %v809_v29, %v361_v21  ;;  %v825_v42 = vadd.f32 1.0, %v1075_v35  ;;  %1080 = vtanh.f32 %v682_v31  ;;  %v634_v43 = vadd.f32 %v570_v10, %v1451_v5  ;;  %v202_v25 = vpop.f32.mrf.mxu0 }
  0xf5   :  { %v586_v46 = vmul.f32 %v522_v33, %v1454_v7  ;;  %v539_v53 = vmul.f32 %v475_v38, %v1458_v9  ;;  %v427_v47 = vmul.f32 0.044715, %v1474_v39  ;;  %v443_v51 = vmul.f32 0.044715, %v1477_v13 }
  0xf6   :  { %v1077_v48 = vpop.eup %1076  ;;  %937 = vst [vmem:[#allocation7 + $0xa8] sm:$0xff] %v873_v41  ;;  %v889_v26 = vmul.f32 %v825_v42, %v377_v28  ;;  %v698_v30 = vmul.f32 0.7978846, %v634_v43  ;;  %v1486_v36 = vadd.f32 %v1277_v56, %v317_v34  ;;  %v362_v59 = vmul.f32 0.5, %v1440_v52 }
  0xf7   :  { %v1079_v54 = vpop.eup %1078  ;;  %v841_v55 = vadd.f32 1.0, %v1077_v48  ;;  %v650_v27 = vadd.f32 %v586_v46, %v1454_v7  ;;  %v603_v32 = vadd.f32 %v539_v53, %v1458_v9  ;;  %v491_v57 = vmul.f32 %v427_v47, %v1474_v39 }
  0xf8   :  { %953 = vst [vmem:[#allocation7 + $0x128] sm:$0xff] %v889_v26  ;;  %v794_v40 = vadd.f32 1.0, %v1079_v54  ;;  %1082 = vtanh.f32 %v698_v30  ;;  %v507_v60 = vmul.f32 %v443_v51, %v1477_v13  ;;  %v459_v8 = vmul.f32 0.044715, %v1486_v36 }
  0xf9   :  { %v905_v63 = vmul.f32 %v841_v55, %v393_v37  ;;  %v714_v0 = vmul.f32 0.7978846, %v650_v27  ;;  %v667_v2 = vmul.f32 0.7978846, %v603_v32  ;;  %v555_v17 = vmul.f32 %v491_v57, %v1474_v39 }
  0xfa   :  { %v1081_v3 = vpop.eup %1080  ;;  %v858_v4 = vmul.f32 %v794_v40, %v346_v45  ;;  %v571_v6 = vmul.f32 %v507_v60, %v1477_v13  ;;  %v1497_v15 = vadd.f32 %v1277_v56, %v200_v44  ;;  %v1501_v50 = vadd.f32 %v1277_v56, %v240_v61  ;;  %v242_v45 = vpop.f32.mrf.mxu1 }
  0xfb   :  { %969 = vst [vmem:[#allocation7 + $0x1a8] sm:$0xff] %v905_v63  ;;  %v810_v52 = vadd.f32 1.0, %v1081_v3  ;;  %1084 = vtanh.f32 %v714_v0  ;;  %v619_v16 = vadd.f32 %v555_v17, %v1474_v39  ;;  %v378_v11 = vmul.f32 0.5, %v1451_v5  ;;  %v282_v46 = vpop.f32.mrf.mxu2  ;;  %v322_v63 = vpop.f32.mrf.mxu3 }
  0xfc   :  { %922 = vst [vmem:[#allocation7 + $0x30] sm:$0xff] %v858_v4  ;;  %1086 = vtanh.f32 %v667_v2  ;;  %v635_v49 = vadd.f32 %v571_v6, %v1477_v13  ;;  %v523_v12 = vmul.f32 %v459_v8, %v1486_v36  ;;  %v394_v20 = vmul.f32 0.5, %v1454_v7  ;;  %v205_v6 = vpop.f32.mrf.mxu0 }
  0xfd   :  { %v874_v19 = vmul.f32 %v810_v52, %v362_v59  ;;  %v683_v21 = vmul.f32 0.7978846, %v619_v16  ;;  %v412_v22 = vmul.f32 0.044715, %v1497_v15  ;;  %v428_v14 = vmul.f32 0.044715, %v1501_v50 }
  0xfe   :  { %v1083_v23 = vpop.eup %1082  ;;  %v699_v1 = vmul.f32 0.7978846, %v635_v49  ;;  %v587_v24 = vmul.f32 %v523_v12, %v1486_v36  ;;  %v1511_v5 = vadd.f32 %v1277_v56, %v280_v62  ;;  %v1515_v7 = vadd.f32 %v1277_v56, %v320_v18 }
  0xff   :  { %938 = vst [vmem:[#allocation7 + $0xb0] sm:$0xff] %v874_v19  ;;  %v826_v28 = vadd.f32 1.0, %v1083_v23  ;;  %1088 = vtanh.f32 %v683_v21  ;;  %v476_v58 = vmul.f32 %v412_v22, %v1497_v15  ;;  %v347_v29 = vmul.f32 0.5, %v1458_v9 }
 0x100   :  { %1090 = vtanh.f32 %v699_v1  ;;  %v651_v31 = vadd.f32 %v587_v24, %v1486_v36  ;;  %v492_v10 = vmul.f32 %v428_v14, %v1501_v50  ;;  %v363_v35 = vmul.f32 0.5, %v1474_v39 }
 0x101   :  { %v1085_v33 = vpop.eup %1084  ;;  %v890_v34 = vmul.f32 %v826_v28, %v378_v11  ;;  %v540_v37 = vmul.f32 %v476_v58, %v1497_v15  ;;  %v444_v38 = vmul.f32 0.044715, %v1511_v5  ;;  %v460_v9 = vmul.f32 0.044715, %v1515_v7 }
 0x102   :  { %v1087_v41 = vpop.eup %1086  ;;  %v842_v42 = vadd.f32 1.0, %v1085_v33  ;;  %v715_v43 = vmul.f32 0.7978846, %v651_v31  ;;  %v556_v44 = vmul.f32 %v492_v10, %v1501_v50  ;;  %v1528_v39 = vadd.f32 %v1277_v56, %v202_v25  ;;  %v245_v14 = vpop.f32.mrf.mxu1 }
 0x103   :  { %954 = vst [vmem:[#allocation7 + $0x130] sm:$0xff] %v890_v34  ;;  %v795_v53 = vadd.f32 1.0, %v1087_v41  ;;  %v604_v47 = vadd.f32 %v540_v37, %v1497_v15  ;;  %v508_v48 = vmul.f32 %v444_v38, %v1511_v5  ;;  %v524_v51 = vmul.f32 %v460_v9, %v1515_v7  ;;  %v285_v25 = vpop.f32.mrf.mxu2 }
 0x104   :  { %v906_v26 = vmul.f32 %v842_v42, %v394_v20  ;;  %1092 = vtanh.f32 %v715_v43  ;;  %v620_v30 = vadd.f32 %v556_v44, %v1501_v50  ;;  %v379_v27 = vmul.f32 0.5, %v1477_v13 }
 0x105   :  { %v1089_v54 = vpop.eup %1088  ;;  %v859_v55 = vmul.f32 %v795_v53, %v347_v29  ;;  %v668_v32 = vmul.f32 0.7978846, %v604_v47  ;;  %v572_v57 = vmul.f32 %v508_v48, %v1511_v5  ;;  %v588_v61 = vmul.f32 %v524_v51, %v1515_v7 }
 0x106   :  { %v1091_v40 = vpop.eup %1090  ;;  %970 = vst [vmem:[#allocation7 + $0x1b0] sm:$0xff] %v906_v26  ;;  %v811_v59 = vadd.f32 1.0, %v1089_v54  ;;  %v684_v60 = vmul.f32 0.7978846, %v620_v30  ;;  %v413_v62 = vmul.f32 0.044715, %v1528_v39  ;;  %v1538_v17 = vadd.f32 %v1277_v56, %v242_v45  ;;  %v325_v45 = vpop.f32.mrf.mxu3 }
 0x107   :  { %923 = vst [vmem:[#allocation7 + $0x38] sm:$0xff] %v859_v55  ;;  %v827_v0 = vadd.f32 1.0, %v1091_v40  ;;  %1094 = vtanh.f32 %v668_v32  ;;  %v636_v2 = vadd.f32 %v572_v57, %v1511_v5  ;;  %v652_v3 = vadd.f32 %v588_v61, %v1515_v7 }
 0x108   :  { %v875_v13 = vmul.f32 %v811_v59, %v363_v35  ;;  %1096 = vtanh.f32 %v684_v60  ;;  %v477_v4 = vmul.f32 %v413_v62, %v1528_v39  ;;  %v395_v52 = vmul.f32 0.5, %v1486_v36  ;;  %v207_v62 = vpop.f32.mrf.mxu0 }
 0x109   :  { %v891_v8 = vmul.f32 %v827_v0, %v379_v27  ;;  %v700_v16 = vmul.f32 0.7978846, %v636_v2  ;;  %v429_v11 = vmul.f32 0.044715, %v1538_v17  ;;  %v716_v12 = vmul.f32 0.7978846, %v652_v3 }
 0x10a   :  { %v1093_v49 = vpop.eup %1092  ;;  %939 = vst [vmem:[#allocation7 + $0xb8] sm:$0xff] %v875_v13  ;;  %v541_v18 = vmul.f32 %v477_v4, %v1528_v39  ;;  %v1546_v19 = vadd.f32 %v1277_v56, %v282_v46  ;;  %v1549_v20 = vadd.f32 %v1277_v56, %v322_v63  ;;  %v1553_v36 = vadd.f32 %v1277_v56, %v205_v6 }
 0x10b   :  { %955 = vst [vmem:[#allocation7 + $0x138] sm:$0xff] %v891_v8  ;;  %v843_v21 = vadd.f32 1.0, %v1093_v49  ;;  %1098 = vtanh.f32 %v700_v16  ;;  %v493_v22 = vmul.f32 %v429_v11, %v1538_v17  ;;  %v348_v23 = vmul.f32 0.5, %v1497_v15  ;;  %v247_v8 = vpop.f32.mrf.mxu1 }
 0x10c   :  { %1100 = vtanh.f32 %v716_v12  ;;  %v605_v1 = vadd.f32 %v541_v18, %v1528_v39  ;;  %v445_v24 = vmul.f32 0.044715, %v1546_v19  ;;  %v364_v29 = vmul.f32 0.5, %v1501_v50 }
 0x10d   :  { %v1095_v28 = vpop.eup %1094  ;;  %v907_v58 = vmul.f32 %v843_v21, %v395_v52  ;;  %v557_v31 = vmul.f32 %v493_v22, %v1538_v17  ;;  %v461_v10 = vmul.f32 0.044715, %v1549_v20  ;;  %v380_v35 = vmul.f32 0.5, %v1511_v5  ;;  %v287_v52 = vpop.f32.mrf.mxu2 }
 0x10e   :  { %v1097_v33 = vpop.eup %1096  ;;  %v796_v34 = vadd.f32 1.0, %v1095_v28  ;;  %v669_v15 = vmul.f32 0.7978846, %v605_v1  ;;  %v509_v37 = vmul.f32 %v445_v24, %v1546_v19  ;;  %v414_v43 = vmul.f32 0.044715, %v1553_v36 }
 0x10f   :  { %971 = vst [vmem:[#allocation7 + $0x1b8] sm:$0xff] %v907_v58  ;;  %v812_v38 = vadd.f32 1.0, %v1097_v33  ;;  %v621_v41 = vadd.f32 %v557_v31, %v1538_v17  ;;  %v525_v42 = vmul.f32 %v461_v10, %v1549_v20  ;;  %v1568_v9 = vadd.f32 %v1277_v56, %v245_v14  ;;  %v327_v58 = vpop.f32.mrf.mxu3 }
 0x110   :  { %v860_v50 = vmul.f32 %v796_v34, %v348_v23  ;;  %1102 = vtanh.f32 %v669_v15  ;;  %v573_v44 = vmul.f32 %v509_v37, %v1546_v19  ;;  %v478_v48 = vmul.f32 %v414_v43, %v1553_v36 }
 0x111   :  { %v1099_v5 = vpop.eup %1098  ;;  %v876_v46 = vmul.f32 %v812_v38, %v364_v29  ;;  %v685_v53 = vmul.f32 0.7978846, %v621_v41  ;;  %v589_v47 = vmul.f32 %v525_v42, %v1549_v20  ;;  %v396_v51 = vmul.f32 0.5, %v1515_v7 }
 0x112   :  { %v1101_v26 = vpop.eup %1100  ;;  %924 = vst [vmem:[#allocation7 + $0x40] sm:$0xff] %v860_v50  ;;  %v828_v30 = vadd.f32 1.0, %v1099_v5  ;;  %v637_v54 = vadd.f32 %v573_v44, %v1546_v19  ;;  %v430_v55 = vmul.f32 0.044715, %v1568_v9  ;;  %v542_v57 = vmul.f32 %v478_v48, %v1553_v36 }
 0x113   :  { %940 = vst [vmem:[#allocation7 + $0xc0] sm:$0xff] %v876_v46  ;;  %v844_v27 = vadd.f32 1.0, %v1101_v26  ;;  %1104 = vtanh.f32 %v685_v53  ;;  %v653_v32 = vadd.f32 %v589_v47, %v1549_v20  ;;  %v1579_v61 = vadd.f32 %v1277_v56, %v285_v25 }
 0x114   :  { %v892_v40 = vmul.f32 %v828_v30, %v380_v35  ;;  %v701_v59 = vmul.f32 0.7978846, %v637_v54  ;;  %v494_v60 = vmul.f32 %v430_v55, %v1568_v9  ;;  %v606_v0 = vadd.f32 %v542_v57, %v1553_v36  ;;  %v250_v54 = vpop.f32.mrf.mxu1 }
 0x115   :  { %v908_v7 = vmul.f32 %v844_v27, %v396_v51  ;;  %v717_v63 = vmul.f32 0.7978846, %v653_v32  ;;  %v1583_v2 = vadd.f32 %v1277_v56, %v325_v45  ;;  %v349_v3 = vmul.f32 0.5, %v1528_v39  ;;  %v1595_v39 = vld [vmem:[%s1769_s2] ss:$0 sm:$0xff]  ;;  %v210_v45 = vpop.f32.mrf.mxu0  ;;  %s1241_s2 = smov [#allocation7]  }
 0x116   :  { %v1103_v13 = vpop.eup %1102  ;;  %956 = vst [vmem:[#allocation7 + $0x140] sm:$0xff] %v892_v40  ;;  %1106 = vtanh.f32 %v701_v59  ;;  %v558_v4 = vmul.f32 %v494_v60, %v1568_v9  ;;  %v446_v6 = vmul.f32 0.044715, %v1579_v61  ;;  %v365_v11 = vmul.f32 0.5, %v1538_v17  ;;  %s984_s26 = sshll.u32 %s1241_s2, 4  ;;  %s985_s26 = int_to_ptr.vmem [resolvable:$true] %s984_s26 }
 0x117   :  { %972 = vst [vmem:[#allocation7 + $0x1c0] sm:$0xff] %v908_v7  ;;  %v797_v16 = vadd.f32 1.0, %v1103_v13  ;;  %1108 = vtanh.f32 %v717_v63  ;;  %v670_v49 = vmul.f32 0.7978846, %v606_v0  ;;  %v462_v18 = vmul.f32 0.044715, %v1583_v2  ;;  %v290_v7 = vpop.f32.mrf.mxu2 }
 0x118   :  { %v622_v56 = vadd.f32 %v558_v4, %v1568_v9  ;;  %v510_v12 = vmul.f32 %v446_v6, %v1579_v61  ;;  %v1598_v21 = vadd.f32 %v1595_v39, %v207_v62  ;;  %v1601_v17 = vadd.f32 %v1595_v39, %v247_v8 }
 0x119   :  { %v1105_v22 = vpop.eup %1104  ;;  %v861_v23 = vmul.f32 %v797_v16, %v349_v3  ;;  %1110 = vtanh.f32 %v670_v49  ;;  %v1604_v1 = vadd.f32 %v1595_v39, %v287_v52  ;;  %v526_v28 = vmul.f32 %v462_v18, %v1583_v2  ;;  %v330_v52 = vpop.f32.mrf.mxu3 }
 0x11a   :  { %v813_v24 = vadd.f32 1.0, %v1105_v22  ;;  %v686_v14 = vmul.f32 0.7978846, %v622_v56  ;;  %v574_v25 = vmul.f32 %v510_v12, %v1579_v61  ;;  %v381_v29 = vmul.f32 0.5, %v1546_v19 }
 0x11b   :  { %925 = vst [vmem:[#allocation7 + $0x48] sm:$0xff] %v861_v23  ;;  %v397_v31 = vmul.f32 0.5, %v1549_v20  ;;  %v350_v10 = vmul.f32 0.5, %v1553_v36  ;;  %v415_v33 = vmul.f32 0.044715, %v1598_v21  ;;  %v590_v37 = vmul.f32 %v526_v28, %v1583_v2 }
 0x11c   :  { %v1107_v34 = vpop.eup %1106  ;;  %v877_v35 = vmul.f32 %v813_v24, %v365_v11  ;;  %1112 = vtanh.f32 %v686_v14  ;;  %v638_v15 = vadd.f32 %v574_v25, %v1579_v61  ;;  %v431_v43 = vmul.f32 0.044715, %v1601_v17 }
 0x11d   :  { %v1109_v38 = vpop.eup %1108  ;;  %v829_v41 = vadd.f32 1.0, %v1107_v34  ;;  %v479_v42 = vmul.f32 %v415_v33, %v1598_v21  ;;  %v447_v19 = vmul.f32 0.044715, %v1604_v1  ;;  %v654_v50 = vadd.f32 %v590_v37, %v1583_v2 }
 0x11e   :  { %941 = vst [vmem:[#allocation7 + $0xc8] sm:$0xff] %v877_v35  ;;  %v845_v20 = vadd.f32 1.0, %v1109_v38  ;;  %v702_v36 = vmul.f32 0.7978846, %v638_v15  ;;  %v1619_v44 = vadd.f32 %v1595_v39, %v327_v58  ;;  %v495_v47 = vmul.f32 %v431_v43, %v1601_v17 }
 0x11f   :  { %v1111_v5 = vpop.eup %1110  ;;  %v893_v46 = vmul.f32 %v829_v41, %v381_v29  ;;  %v543_v53 = vmul.f32 %v479_v42, %v1598_v21  ;;  %v511_v48 = vmul.f32 %v447_v19, %v1604_v1  ;;  %v718_v51 = vmul.f32 0.7978846, %v654_v50  ;;  %v212_v29 = vpop.f32.mrf.mxu0 }
 0x120   :  { %v909_v26 = vmul.f32 %v845_v20, %v397_v31  ;;  %v798_v30 = vadd.f32 1.0, %v1111_v5  ;;  %1114 = vtanh.f32 %v702_v36  ;;  %v366_v55 = vmul.f32 0.5, %v1568_v9  ;;  %v252_v41 = vpop.f32.mrf.mxu1 }
 0x121   :  { %957 = vst [vmem:[#allocation7 + $0x148] sm:$0xff] %v893_v46  ;;  %v607_v27 = vadd.f32 %v543_v53, %v1598_v21  ;;  %v559_v32 = vmul.f32 %v495_v47, %v1601_v17  ;;  %v575_v57 = vmul.f32 %v511_v48, %v1604_v1  ;;  %1116 = vtanh.f32 %v718_v51 }
 0x122   :  { %v1113_v40 = vpop.eup %1112  ;;  %973 = vst [vmem:[#allocation7 + $0x1c8] sm:$0xff] %v909_v26  ;;  %v862_v59 = vmul.f32 %v798_v30, %v350_v10  ;;  %v463_v60 = vmul.f32 0.044715, %v1619_v44  ;;  %v1630_v62 = vadd.f32 %v1595_v39, %v210_v45  ;;  %v382_v3 = vmul.f32 0.5, %v1579_v61  ;;  %v292_v45 = vpop.f32.mrf.mxu2 }
 0x123   :  { %v814_v63 = vadd.f32 1.0, %v1113_v40  ;;  %v671_v0 = vmul.f32 0.7978846, %v607_v27  ;;  %v623_v9 = vadd.f32 %v559_v32, %v1601_v17  ;;  %v639_v13 = vadd.f32 %v575_v57, %v1604_v1 }
 0x124   :  { %926 = vst [vmem:[#allocation7 + $0x50] sm:$0xff] %v862_v59  ;;  %v527_v4 = vmul.f32 %v463_v60, %v1619_v44  ;;  %v416_v6 = vmul.f32 0.044715, %v1630_v62  ;;  %v1638_v8 = vadd.f32 %v1595_v39, %v250_v54  ;;  %v398_v12 = vmul.f32 0.5, %v1583_v2 }
 0x125   :  { %v878_v16 = vmul.f32 %v814_v63, %v366_v55  ;;  %1118 = vtanh.f32 %v671_v0  ;;  %v687_v11 = vmul.f32 0.7978846, %v623_v9  ;;  %v703_v49 = vmul.f32 0.7978846, %v639_v13  ;;  %v332_v55 = vpop.f32.mrf.mxu3 }
 0x126   :  { %v1115_v56 = vpop.eup %1114  ;;  %v591_v18 = vmul.f32 %v527_v4, %v1619_v44  ;;  %v480_v22 = vmul.f32 %v416_v6, %v1630_v62  ;;  %v432_v61 = vmul.f32 0.044715, %v1638_v8  ;;  %v1645_v24 = vadd.f32 %v1595_v39, %v290_v7 }
 0x127   :  { %942 = vst [vmem:[#allocation7 + $0xd0] sm:$0xff] %v878_v16  ;;  %v830_v23 = vadd.f32 1.0, %v1115_v56  ;;  %1120 = vtanh.f32 %v687_v11  ;;  %v1648_v14 = vadd.f32 %v1595_v39, %v330_v52  ;;  %v1117_v25 = vpop.eup %1116  ;;  %v351_v33 = vmul.f32 0.5, %v1598_v21  ;;  %v215_v56 = vpop.f32.mrf.mxu0 }
 0x128   :  { %1122 = vtanh.f32 %v703_v49  ;;  %v655_v28 = vadd.f32 %v591_v18, %v1619_v44  ;;  %v544_v2 = vmul.f32 %v480_v22, %v1630_v62  ;;  %v496_v58 = vmul.f32 %v432_v61, %v1638_v8  ;;  %v255_v61 = vpop.f32.mrf.mxu1 }
 0x129   :  { %v894_v31 = vmul.f32 %v830_v23, %v382_v3  ;;  %v846_v10 = vadd.f32 1.0, %v1117_v25  ;;  %v448_v34 = vmul.f32 0.044715, %v1645_v24  ;;  %v367_v35 = vmul.f32 0.5, %v1601_v17 }
 0x12a   :  { %v719_v15 = vmul.f32 0.7978846, %v655_v28  ;;  %v608_v37 = vadd.f32 %v544_v2, %v1630_v62  ;;  %v560_v38 = vmul.f32 %v496_v58, %v1638_v8  ;;  %v464_v20 = vmul.f32 0.044715, %v1648_v14 }
 0x12b   :  { %v1119_v42 = vpop.eup %1118  ;;  %958 = vst [vmem:[#allocation7 + $0x150] sm:$0xff] %v894_v31  ;;  %v910_v43 = vmul.f32 %v846_v10, %v398_v12  ;;  %v512_v19 = vmul.f32 %v448_v34, %v1645_v24  ;;  %v1661_v36 = vadd.f32 %v1595_v39, %v212_v29  ;;  %v383_v46 = vmul.f32 0.5, %v1604_v1  ;;  %v295_v10 = vpop.f32.mrf.mxu2 }
 0x12c   :  { %v799_v21 = vadd.f32 1.0, %v1119_v42  ;;  %1124 = vtanh.f32 %v719_v15  ;;  %v672_v50 = vmul.f32 0.7978846, %v608_v37  ;;  %v624_v17 = vadd.f32 %v560_v38, %v1638_v8 }
 0x12d   :  { %v1121_v5 = vpop.eup %1120  ;;  %974 = vst [vmem:[#allocation7 + $0x1d0] sm:$0xff] %v910_v43  ;;  %v576_v53 = vmul.f32 %v512_v19, %v1645_v24  ;;  %v528_v47 = vmul.f32 %v464_v20, %v1648_v14  ;;  %v417_v48 = vmul.f32 0.044715, %v1661_v36  ;;  %v1672_v59 = vadd.f32 %v1595_v39, %v252_v41  ;;  %v335_v42 = vpop.f32.mrf.mxu3 }
 0x12e   :  { %v1123_v26 = vpop.eup %1122  ;;  %v863_v30 = vmul.f32 %v799_v21, %v351_v33  ;;  %v815_v51 = vadd.f32 1.0, %v1121_v5  ;;  %1126 = vtanh.f32 %v672_v50  ;;  %v688_v54 = vmul.f32 0.7978846, %v624_v17 }
 0x12f   :  { %v831_v27 = vadd.f32 1.0, %v1123_v26  ;;  %v640_v32 = vadd.f32 %v576_v53, %v1645_v24  ;;  %v592_v57 = vmul.f32 %v528_v47, %v1648_v14  ;;  %v481_v40 = vmul.f32 %v417_v48, %v1661_v36 }
 0x130   :  { %927 = vst [vmem:[#allocation7 + $0x58] sm:$0xff] %v863_v30  ;;  %v879_v1 = vmul.f32 %v815_v51, %v367_v35  ;;  %1128 = vtanh.f32 %v688_v54  ;;  %v1675_v60 = vadd.f32 %v1595_v39, %v292_v45  ;;  %v399_v3 = vmul.f32 0.5, %v1619_v44 }
 0x131   :  { %v895_v7 = vmul.f32 %v831_v27, %v383_v46  ;;  %v704_v63 = vmul.f32 0.7978846, %v640_v32  ;;  %v656_v0 = vadd.f32 %v592_v57, %v1648_v14  ;;  %v545_v9 = vmul.f32 %v481_v40, %v1661_v36  ;;  %v217_v40 = vpop.f32.mrf.mxu0 }
 0x132   :  { %v1125_v13 = vpop.eup %1124  ;;  %943 = vst [vmem:[#allocation7 + $0xd8] sm:$0xff] %v879_v1  ;;  %v352_v4 = vmul.f32 0.5, %v1630_v62  ;;  %v433_v6 = vmul.f32 0.044715, %v1672_v59  ;;  %v1683_v52 = vadd.f32 %v1595_v39, %v332_v55  ;;  %v368_v18 = vmul.f32 0.5, %v1638_v8 }
 0x133   :  { %959 = vst [vmem:[#allocation7 + $0x158] sm:$0xff] %v895_v7  ;;  %v847_v16 = vadd.f32 1.0, %v1125_v13  ;;  %1130 = vtanh.f32 %v704_v63  ;;  %v720_v11 = vmul.f32 0.7978846, %v656_v0  ;;  %v609_v49 = vadd.f32 %v545_v9, %v1661_v36  ;;  %v257_v0 = vpop.f32.mrf.mxu1 }
 0x134   :  { %v1127_v12 = vpop.eup %1126  ;;  %v497_v22 = vmul.f32 %v433_v6, %v1672_v59  ;;  %v449_v44 = vmul.f32 0.044715, %v1675_v60  ;;  %v465_v62 = vmul.f32 0.044715, %v1683_v52  ;;  %v1694_v8 = vadd.f32 %v1595_v39, %v215_v56 }
 0x135   :  { %v911_v23 = vmul.f32 %v847_v16, %v399_v3  ;;  %v800_v25 = vadd.f32 1.0, %v1127_v12  ;;  %1132 = vtanh.f32 %v720_v11  ;;  %v673_v28 = vmul.f32 0.7978846, %v609_v49  ;;  %v297_v16 = vpop.f32.mrf.mxu2 }
 0x136   :  { %v1129_v2 = vpop.eup %1128  ;;  %v561_v58 = vmul.f32 %v497_v22, %v1672_v59  ;;  %v513_v29 = vmul.f32 %v449_v44, %v1675_v60  ;;  %v529_v31 = vmul.f32 %v465_v62, %v1683_v52  ;;  %v1697_v35 = vadd.f32 %v1595_v39, %v255_v61 }
 0x137   :  { %975 = vst [vmem:[#allocation7 + $0x1d8] sm:$0xff] %v911_v23  ;;  %v864_v33 = vmul.f32 %v800_v25, %v352_v4  ;;  %v816_v34 = vadd.f32 1.0, %v1129_v2  ;;  %1134 = vtanh.f32 %v673_v28  ;;  %v384_v15 = vmul.f32 0.5, %v1645_v24 }
 0x138   :  { %v625_v37 = vadd.f32 %v561_v58, %v1672_v59  ;;  %v577_v38 = vmul.f32 %v513_v29, %v1675_v60  ;;  %v593_v41 = vmul.f32 %v529_v31, %v1683_v52  ;;  %v400_v20 = vmul.f32 0.5, %v1648_v14  ;;  %v337_v29 = vpop.f32.mrf.mxu3 }
 0x139   :  { %v1131_v43 = vpop.eup %1130  ;;  %928 = vst [vmem:[#allocation7 + $0x60] sm:$0xff] %v864_v33  ;;  %v880_v19 = vmul.f32 %v816_v34, %v368_v18  ;;  %v418_v21 = vmul.f32 0.044715, %v1694_v8  ;;  %v434_v50 = vmul.f32 0.044715, %v1697_v35  ;;  %v1711_v48 = vadd.f32 %v1595_v39, %v295_v10 }
 0x13a   :  { %v832_v17 = vadd.f32 1.0, %v1131_v43  ;;  %v689_v45 = vmul.f32 0.7978846, %v625_v37  ;;  %v641_v24 = vadd.f32 %v577_v38, %v1675_v60  ;;  %v657_v5 = vadd.f32 %v593_v41, %v1683_v52 }
 0x13b   :  { %v1133_v46 = vpop.eup %1132  ;;  %944 = vst [vmem:[#allocation7 + $0xe0] sm:$0xff] %v880_v19  ;;  %v482_v53 = vmul.f32 %v418_v21, %v1694_v8  ;;  %v498_v47 = vmul.f32 %v434_v50, %v1697_v35  ;;  %v1714_v14 = vadd.f32 %v1595_v39, %v335_v42  ;;  %v353_v55 = vmul.f32 0.5, %v1661_v36 }
 0x13c   :  { %v896_v26 = vmul.f32 %v832_v17, %v384_v15  ;;  %v848_v30 = vadd.f32 1.0, %v1133_v46  ;;  %1136 = vtanh.f32 %v689_v45  ;;  %v705_v51 = vmul.f32 0.7978846, %v641_v24 }
 0x13d   :  { %v1135_v54 = vpop.eup %1134  ;;  %v721_v27 = vmul.f32 0.7978846, %v657_v5  ;;  %v546_v32 = vmul.f32 %v482_v53, %v1694_v8  ;;  %v562_v57 = vmul.f32 %v498_v47, %v1697_v35  ;;  %v450_v63 = vmul.f32 0.044715, %v1711_v48 }
 0x13e   :  { %960 = vst [vmem:[#allocation7 + $0x160] sm:$0xff] %v896_v26  ;;  %v912_v1 = vmul.f32 %v848_v30, %v400_v20  ;;  %v801_v7 = vadd.f32 1.0, %v1135_v54  ;;  %1138 = vtanh.f32 %v705_v51  ;;  %v466_v4 = vmul.f32 0.044715, %v1714_v14 }
 0x13f   :  { %1140 = vtanh.f32 %v721_v27  ;;  %v610_v9 = vadd.f32 %v546_v32, %v1694_v8  ;;  %v626_v13 = vadd.f32 %v562_v57, %v1697_v35  ;;  %v514_v3 = vmul.f32 %v450_v63, %v1711_v48 }
 0x140   :  { %976 = vst [vmem:[#allocation7 + $0x1e0] sm:$0xff] %v912_v1  ;;  %v865_v36 = vmul.f32 %v801_v7, %v353_v55  ;;  %v1725_v6 = vadd.f32 %v1595_v39, %v217_v40  ;;  %v369_v11 = vmul.f32 0.5, %v1672_v59  ;;  %v1729_v12 = vadd.f32 %v1595_v39, %v257_v0 }
 0x141   :  { %v674_v49 = vmul.f32 0.7978846, %v610_v9  ;;  %v690_v56 = vmul.f32 0.7978846, %v626_v13  ;;  %v385_v22 = vmul.f32 0.5, %v1675_v60  ;;  %v578_v44 = vmul.f32 %v514_v3, %v1711_v48 }
 0x142   :  { %v1137_v18 = vpop.eup %1136  ;;  %929 = vst [vmem:[#allocation7 + $0x68] sm:$0xff] %v865_v36  ;;  %v530_v62 = vmul.f32 %v466_v4, %v1714_v14  ;;  %v419_v61 = vmul.f32 0.044715, %v1725_v6  ;;  %v435_v25 = vmul.f32 0.044715, %v1729_v12  ;;  %v1737_v59 = vadd.f32 %v1595_v39, %v297_v16 }
 0x143   :  { %v817_v23 = vadd.f32 1.0, %v1137_v18  ;;  %1142 = vtanh.f32 %v674_v49  ;;  %v642_v2 = vadd.f32 %v578_v44, %v1711_v48  ;;  %v401_v34 = vmul.f32 0.5, %v1683_v52 }
 0x144   :  { %v1139_v28 = vpop.eup %1138  ;;  %1144 = vtanh.f32 %v690_v56  ;;  %v594_v58 = vmul.f32 %v530_v62, %v1714_v14  ;;  %v483_v60 = vmul.f32 %v419_v61, %v1725_v6  ;;  %v499_v15 = vmul.f32 %v435_v25, %v1729_v12 }
 0x145   :  { %v1141_v31 = vpop.eup %1140  ;;  %v881_v10 = vmul.f32 %v817_v23, %v369_v11  ;;  %v833_v33 = vadd.f32 1.0, %v1139_v28  ;;  %v706_v38 = vmul.f32 0.7978846, %v642_v2  ;;  %v451_v20 = vmul.f32 0.044715, %v1737_v59 }
 0x146   :  { %v849_v37 = vadd.f32 1.0, %v1141_v31  ;;  %v658_v41 = vadd.f32 %v594_v58, %v1714_v14  ;;  %v547_v42 = vmul.f32 %v483_v60, %v1725_v6  ;;  %v563_v19 = vmul.f32 %v499_v15, %v1729_v12 }
 0x147   :  { %945 = vst [vmem:[#allocation7 + $0xe8] sm:$0xff] %v881_v10  ;;  %v897_v43 = vmul.f32 %v833_v33, %v385_v22  ;;  %v338_v21 = vadd.f32 %v1595_v39, %v337_v29  ;;  %1146 = vtanh.f32 %v706_v38  ;;  %v354_v24 = vmul.f32 0.5, %v1694_v8 }
 0x148   :  { %v913_v50 = vmul.f32 %v849_v37, %v401_v34  ;;  %v722_v17 = vmul.f32 0.7978846, %v658_v41  ;;  %v611_v52 = vadd.f32 %v547_v42, %v1725_v6  ;;  %v627_v5 = vadd.f32 %v563_v19, %v1729_v12 }
 0x149   :  { %v1143_v45 = vpop.eup %1142  ;;  %961 = vst [vmem:[#allocation7 + $0x168] sm:$0xff] %v897_v43  ;;  %v515_v46 = vmul.f32 %v451_v20, %v1737_v59  ;;  %v467_v53 = vmul.f32 0.044715, %v338_v21  ;;  %v370_v30 = vmul.f32 0.5, %v1697_v35  ;;  %v386_v7 = vmul.f32 0.5, %v1711_v48 }
 0x14a   :  { %v1145_v47 = vpop.eup %1144  ;;  %977 = vst [vmem:[#allocation7 + $0x1e8] sm:$0xff] %v913_v50  ;;  %v802_v26 = vadd.f32 1.0, %v1143_v45  ;;  %1148 = vtanh.f32 %v722_v17  ;;  %v675_v39 = vmul.f32 0.7978846, %v611_v52  ;;  %v691_v54 = vmul.f32 0.7978846, %v627_v5 }
 0x14b   :  { %v818_v51 = vadd.f32 1.0, %v1145_v47  ;;  %v579_v55 = vmul.f32 %v515_v46, %v1737_v59  ;;  %v531_v27 = vmul.f32 %v467_v53, %v338_v21  ;;  %v402_v13 = vmul.f32 0.5, %v1714_v14 }
 0x14c   :  { %v866_v32 = vmul.f32 %v802_v26, %v354_v24  ;;  %1150 = vtanh.f32 %v675_v39  ;;  %v355_v56 = vmul.f32 0.5, %v1725_v6  ;;  %v371_v48 = vmul.f32 0.5, %v1729_v12 }
 0x14d   :  { %v882_v8 = vmul.f32 %v818_v51, %v370_v30  ;;  %1152 = vtanh.f32 %v691_v54  ;;  %v643_v57 = vadd.f32 %v579_v55, %v1737_v59  ;;  %v595_v40 = vmul.f32 %v531_v27, %v338_v21  ;;  %v1147_v1 = vpop.eup %1146 }
 0x14e   :  { %930 = vst [vmem:[#allocation7 + $0x70] sm:$0xff] %v866_v32  ;;  %v834_v35 = vadd.f32 1.0, %v1147_v1  ;;  %v387_v14 = vmul.f32 0.5, %v1737_v59  ;;  %v403_v28 = vmul.f32 0.5, %v338_v21 }
 0x14f   :  { %946 = vst [vmem:[#allocation7 + $0xf0] sm:$0xff] %v882_v8  ;;  %v707_v63 = vmul.f32 0.7978846, %v643_v57  ;;  %v659_v0 = vadd.f32 %v595_v40, %v338_v21 }
 0x150   :  { %v1149_v9 = vpop.eup %1148  ;;  %v898_v36 = vmul.f32 %v834_v35, %v386_v7 }
 0x151   :  { %v850_v3 = vadd.f32 1.0, %v1149_v9  ;;  %1154 = vtanh.f32 %v707_v63  ;;  %v723_v4 = vmul.f32 0.7978846, %v659_v0 }
 0x152   :  { %v1151_v16 = vpop.eup %1150  ;;  %962 = vst [vmem:[#allocation7 + $0x170] sm:$0xff] %v898_v36 }
 0x153   :  { %v1153_v11 = vpop.eup %1152  ;;  %v914_v49 = vmul.f32 %v850_v3, %v402_v13  ;;  %v803_v18 = vadd.f32 1.0, %v1151_v16  ;;  %1156 = vtanh.f32 %v723_v4 }
 0x154   :  { %v819_v22 = vadd.f32 1.0, %v1153_v11 }
 0x155   :  { %978 = vst [vmem:[#allocation7 + $0x1f0] sm:$0xff] %v914_v49  ;;  %v867_v44 = vmul.f32 %v803_v18, %v355_v56 }
 0x156   :  { %v883_v62 = vmul.f32 %v819_v22, %v371_v48 }
 0x157   :  { %v1155_v61 = vpop.eup %1154  ;;  %931 = vst [vmem:[#allocation7 + $0x78] sm:$0xff] %v867_v44 }
 0x158   :  { %947 = vst [vmem:[#allocation7 + $0xf8] sm:$0xff] %v883_v62  ;;  %v835_v23 = vadd.f32 1.0, %v1155_v61 }
 0x159   :  { %v1157_v25 = vpop.eup %1156 }
 0x15a   :  { %v899_v6 = vmul.f32 %v835_v23, %v387_v14  ;;  %v851_v12 = vadd.f32 1.0, %v1157_v25 }
 0x15c   :  { %963 = vst [vmem:[#allocation7 + $0x178] sm:$0xff] %v899_v6  ;;  %v915_v2 = vmul.f32 %v851_v12, %v403_v28 }
 0x15e   :  { %979 = vst [vmem:[#allocation7 + $0x1f8] sm:$0xff] %v915_v2 }
 0x15f   :  { %992 = dma.vmem_to_hbm [thread:$0]  %s985_s26, 8192, %s987_s29, [#allocation4], %s1238_s20, %s1238_s20, %s1239_s21  }
 0x160   :  { %1235 = dma.done.wait [#allocation4], 8192  }
 0x161   :  { %1236 = vsyncadd [#allocation4], 4294959104 }
 0x162   :  { %997 = vsyncpa [#allocation3], 1 }
 0x163   :  { %998 = vsyncpa [#allocation6], 1 }
 0x164   :  { %999 = vsyncpa [#allocation4], 1 }

</bundles_post_ra>
